<compile_context>
chip_gen: v6e
topology: v6e:2x2x1
jax: 0.10.0
libtpu: 0.0.40
codegen_flags: <defaults>
</compile_context>

<pallas_src>
import functools

import jax
import jax.numpy as jnp
from jax import lax
from jax.experimental import pallas as pl
from jax.experimental.pallas import tpu as pltpu
import numpy as np


def make_gru_kernel(num_layers, T, B, E, H):
    """B is the per-grid-block (padded) batch, a multiple of 8 (f32 sublanes)."""

    def kernel(x_ref, *refs):
        # refs layout:
        #   num_layers * [w_ih (in,3H) bf16, w_hh (H,3H) bf16,
        #                 bias (1,3H) f32 (= b_ih + [b_hh_r|b_hh_z|0]),
        #                 b_hh_n (1,H) f32]
        #   then w_lin (H,H) bf16, b_lin (1,H) f32, out_ref (B,H) f32,
        #   scratch: seq_ref (T,B,H) bf16, gi_ref (T,B,3H) f32
        layer_refs = refs[:4 * num_layers]
        w_lin_ref = refs[4 * num_layers + 0]
        b_lin_ref = refs[4 * num_layers + 1]
        out_ref = refs[4 * num_layers + 2]
        seq_ref = refs[4 * num_layers + 3]
        gi_ref = refs[4 * num_layers + 4]

        h_last = None
        for layer in range(num_layers):
            w_ih = layer_refs[4 * layer + 0][...]
            w_hh = layer_refs[4 * layer + 1][...]
            bias = layer_refs[4 * layer + 2][...]
            b_hh_n = layer_refs[4 * layer + 3][...]

            in_dim = E if layer == 0 else H
            if layer == 0:
                xin = x_ref[...].reshape(T * B, in_dim)          # (T*B, E) bf16
            else:
                xin = seq_ref[...].reshape(T * B, in_dim)        # (T*B, H) bf16

            # One big GEMM for the whole layer's input projection, biases folded.
            gi_all = jnp.dot(xin, w_ih, preferred_element_type=jnp.float32) + bias
            gi_ref[...] = gi_all.reshape(T, B, 3 * H)

            # Hoist the n-gate hidden-bias broadcast out of the time loop.
            b_hh_n_b = jnp.broadcast_to(b_hh_n, (B, H))
            last_layer = layer == num_layers - 1

            def step(t, h, w_hh=w_hh, b_hh_n_b=b_hh_n_b, last_layer=last_layer):
                gi = gi_ref[t]                                    # (B, 3H) f32
                gh = jnp.dot(h.astype(w_hh.dtype), w_hh,
                             preferred_element_type=jnp.float32)  # (B, 3H) f32
                # Fused sigmoid over the contiguous [r|z] slice.
                rz = jax.nn.sigmoid(gi[:, :2 * H] + gh[:, :2 * H])
                r = rz[:, :H]
                z = rz[:, H:]
                n = jnp.tanh(gi[:, 2 * H:] + r * (gh[:, 2 * H:] + b_hh_n_b))
                h_new = (1.0 - z) * n + z * h
                if not last_layer:
                    seq_ref[t] = h_new.astype(seq_ref.dtype)      # feeds next layer
                return h_new

            h0 = jnp.zeros((B, H), jnp.float32)
            h_last = lax.fori_loop(0, T, step, h0, unroll=True)

        w_lin = w_lin_ref[...]
        out = jnp.dot(h_last.astype(w_lin.dtype), w_lin,
                      preferred_element_type=jnp.float32) + b_lin_ref[...]
        out_ref[...] = out.astype(out_ref.dtype)

    return kernel


def headings_lstm_forward(headings, params, *, num_layers, hidden_size):
    emb_table = params["embedding"]                   # (V, E)
    B, T = headings.shape
    E = emb_table.shape[1]
    H = hidden_size

    # Embedding lookup + (identity) dropout, gathered directly in time-major
    # (T, B, E) order so no separate HBM transpose pass is needed.
    # TODO(synk): the gather itself stays in plain JAX (in-kernel row-gather via
    # scalar prefetch is not worth the complexity at these sizes).
    x = jnp.take(emb_table, headings.T, axis=0)       # (T, B, E)

    # Pad batch up to a multiple of the f32 sublane count (8).
    B_blk = 8
    B_pad = ((B + B_blk - 1) // B_blk) * B_blk
    if B_pad != B:
        x = jnp.pad(x, ((0, 0), (0, B_pad - B), (0, 0)))
    x = x.astype(jnp.bfloat16)                        # bf16 MXU operands

    def full_spec(shape):
        return pl.BlockSpec(shape, lambda b, _n=len(shape): (0,) * _n)

    kernel_inputs = [x]
    in_specs = [pl.BlockSpec((T, B_blk, E), lambda b: (0, b, 0))]

    for layer in range(num_layers):
        w_ih = params[f"w_ih_{layer}"].astype(jnp.bfloat16)       # (in, 3H)
        w_hh = params[f"w_hh_{layer}"].astype(jnp.bfloat16)       # (H, 3H)
        b_ih = params[f"b_ih_{layer}"]
        b_hh = params[f"b_hh_{layer}"]
        # Fold b_ih and the r/z part of b_hh into the precomputed input proj;
        # the n part of b_hh must stay separate (multiplied by r in the loop).
        bias = (b_ih + jnp.concatenate(
            [b_hh[:2 * H], jnp.zeros((H,), b_hh.dtype)])).reshape(1, 3 * H)
        b_hh_n = b_hh[2 * H:].reshape(1, H)
        kernel_inputs += [w_ih, w_hh,
                          bias.astype(jnp.float32), b_hh_n.astype(jnp.float32)]
        in_specs += [full_spec(w_ih.shape), full_spec(w_hh.shape),
                     full_spec(bias.shape), full_spec(b_hh_n.shape)]

    w_lin = params["w_lin"].astype(jnp.bfloat16)                  # (H, H) (in,out)
    b_lin = params["b_lin"].reshape(1, H).astype(jnp.float32)
    kernel_inputs += [w_lin, b_lin]
    in_specs += [full_spec(w_lin.shape), full_spec(b_lin.shape)]

    out = pl.pallas_call(
        make_gru_kernel(num_layers, T, B_blk, E, H),
        out_shape=jax.ShapeDtypeStruct((B_pad, H), jnp.float32),
        grid_spec=pltpu.PrefetchScalarGridSpec(
            num_scalar_prefetch=0,
            grid=(B_pad // B_blk,),
            in_specs=in_specs,
            out_specs=pl.BlockSpec((B_blk, H), lambda b: (b, 0)),
            scratch_shapes=[pltpu.VMEM((T, B_blk, H), jnp.bfloat16),
                            pltpu.VMEM((T, B_blk, 3 * H), jnp.float32)]),
        compiler_params=pltpu.CompilerParams(
            # Batch-block axis is embarrassingly parallel -> shards across the
            # two TensorCores on v7x; no-op on v5e/v6e.
            dimension_semantics=("parallel",)),
    )(*kernel_inputs)
    return out[:B]


def reference_forward(headings, params, *, num_layers, hidden_size):
    """Pure-JAX f32 reference mirroring torch.nn.GRU (gate order r,z,n) + Linear."""
    H = hidden_size
    emb = jnp.take(params["embedding"], headings, axis=0).astype(jnp.float32)  # (B,T,E)
    B, T, _ = emb.shape
    layer_in = emb
    h_last = None
    for layer in range(num_layers):
        w_ih = params[f"w_ih_{layer}"]
        w_hh = params[f"w_hh_{layer}"]
        b_ih = params[f"b_ih_{layer}"]
        b_hh = params[f"b_hh_{layer}"]
        h = jnp.zeros((B, H), jnp.float32)
        outs = []
        for t in range(T):
            x_t = layer_in[:, t, :]
            gi = x_t @ w_ih + b_ih
            gh = h @ w_hh + b_hh
            r = jax.nn.sigmoid(gi[:, :H] + gh[:, :H])
            z = jax.nn.sigmoid(gi[:, H:2 * H] + gh[:, H:2 * H])
            n = jnp.tanh(gi[:, 2 * H:] + r * gh[:, 2 * H:])
            h = (1.0 - z) * n + z * h
            outs.append(h)
        layer_in = jnp.stack(outs, axis=1)
        h_last = h
    return h_last @ params["w_lin"] + params["b_lin"]


def init_params(key, vocab_size, embed_size, hidden_size, num_layers):
    params = {}
    k = 1.0 / np.sqrt(hidden_size)
    key, sub = jax.random.split(key)
    params["embedding"] = jax.random.normal(sub, (vocab_size, embed_size), jnp.float32)
    for layer in range(num_layers):
        in_dim = embed_size if layer == 0 else hidden_size
        key, k1, k2, k3, k4 = jax.random.split(key, 5)
        params[f"w_ih_{layer}"] = jax.random.uniform(
            k1, (in_dim, 3 * hidden_size), jnp.float32, -k, k)
        params[f"w_hh_{layer}"] = jax.random.uniform(
            k2, (hidden_size, 3 * hidden_size), jnp.float32, -k, k)
        params[f"b_ih_{layer}"] = jax.random.uniform(
            k3, (3 * hidden_size,), jnp.float32, -k, k)
        params[f"b_hh_{layer}"] = jax.random.uniform(
            k4, (3 * hidden_size,), jnp.float32, -k, k)
    key, k1, k2 = jax.random.split(key, 3)
    params["w_lin"] = jax.random.uniform(
        k1, (hidden_size, hidden_size), jnp.float32, -k, k)  # stored as (in, out)
    params["b_lin"] = jax.random.uniform(k2, (hidden_size,), jnp.float32, -k, k)
    return params


if __name__ == "__main__":
    vocab_size, embed_size, hidden_size, num_layers = 50, 32, 32, 2
    B, T = 2, 8

    key = jax.random.PRNGKey(0)
    key, pkey, dkey = jax.random.split(key, 3)
    params = init_params(pkey, vocab_size, embed_size, hidden_size, num_layers)
    headings = jax.random.randint(dkey, (B, T), 0, vocab_size, dtype=jnp.int32)

    fwd = functools.partial(headings_lstm_forward,
                            num_layers=num_layers, hidden_size=hidden_size)
    out = jax.block_until_ready(fwd(headings, params))

    ref = reference_forward(headings, params,
                            num_layers=num_layers, hidden_size=hidden_size)
    # Looser tolerance than pure-f32: kernel uses bf16 MXU operands
    # (gate elementwise math stays f32).
    np.testing.assert_allclose(np.asarray(out), np.asarray(ref),
                               rtol=2e-2, atol=2e-2)
    print("KERNEL_OK")
</pallas_src>

<mosaic_0001>
module attributes {stable_mosaic.version = 11 : i64} {
  func.func @kernel(%arg0: i32, %arg1: memref<8x8x32xbf16, #tpu.memory_space<vmem>>, %arg2: memref<32x96xbf16, #tpu.memory_space<vmem>>, %arg3: memref<32x96xbf16, #tpu.memory_space<vmem>>, %arg4: memref<1x96xf32, #tpu.memory_space<vmem>>, %arg5: memref<1x32xf32, #tpu.memory_space<vmem>>, %arg6: memref<32x96xbf16, #tpu.memory_space<vmem>>, %arg7: memref<32x96xbf16, #tpu.memory_space<vmem>>, %arg8: memref<1x96xf32, #tpu.memory_space<vmem>>, %arg9: memref<1x32xf32, #tpu.memory_space<vmem>>, %arg10: memref<32x32xbf16, #tpu.memory_space<vmem>>, %arg11: memref<1x32xf32, #tpu.memory_space<vmem>>, %arg12: memref<8x32xf32, #tpu.memory_space<vmem>>, %arg13: memref<8x8x32xbf16, #tpu.memory_space<vmem>>, %arg14: memref<8x8x96xf32, #tpu.memory_space<vmem>>) attributes {dimension_semantics = [#tpu.dimension_semantics<parallel>], iteration_bounds = array<i64: 1>, scalar_prefetch = 0 : i64, scratch_operands = 2 : i64, tpu.core_type = #tpu.core_type<tc>, window_params = [{transform_indices = @transform_0, window_bounds = array<i64: 8, 8, 32>}, {pipeline_mode = #tpu.pipeline_mode<synchronous>, transform_indices = @transform_1, window_bounds = array<i64: 32, 96>}, {pipeline_mode = #tpu.pipeline_mode<synchronous>, transform_indices = @transform_2, window_bounds = array<i64: 32, 96>}, {pipeline_mode = #tpu.pipeline_mode<synchronous>, transform_indices = @transform_3, window_bounds = array<i64: 1, 96>}, {pipeline_mode = #tpu.pipeline_mode<synchronous>, transform_indices = @transform_4, window_bounds = array<i64: 1, 32>}, {pipeline_mode = #tpu.pipeline_mode<synchronous>, transform_indices = @transform_5, window_bounds = array<i64: 32, 96>}, {pipeline_mode = #tpu.pipeline_mode<synchronous>, transform_indices = @transform_6, window_bounds = array<i64: 32, 96>}, {pipeline_mode = #tpu.pipeline_mode<synchronous>, transform_indices = @transform_7, window_bounds = array<i64: 1, 96>}, {pipeline_mode = #tpu.pipeline_mode<synchronous>, transform_indices = @transform_8, window_bounds = array<i64: 1, 32>}, {pipeline_mode = #tpu.pipeline_mode<synchronous>, transform_indices = @transform_9, window_bounds = array<i64: 32, 32>}, {pipeline_mode = #tpu.pipeline_mode<synchronous>, transform_indices = @transform_10, window_bounds = array<i64: 1, 32>}, {transform_indices = @transform_11, window_bounds = array<i64: 8, 32>}]} {
    %c0 = arith.constant 0 : index
    %c0_0 = arith.constant 0 : index
    %0 = vector.load %arg2[%c0, %c0_0] : memref<32x96xbf16, #tpu.memory_space<vmem>>, vector<32x96xbf16>
    %c0_1 = arith.constant 0 : index
    %c0_2 = arith.constant 0 : index
    %1 = vector.load %arg3[%c0_1, %c0_2] : memref<32x96xbf16, #tpu.memory_space<vmem>>, vector<32x96xbf16>
    %c0_3 = arith.constant 0 : index
    %c0_4 = arith.constant 0 : index
    %2 = vector.load %arg4[%c0_3, %c0_4] : memref<1x96xf32, #tpu.memory_space<vmem>>, vector<1x96xf32>
    %c0_5 = arith.constant 0 : index
    %c0_6 = arith.constant 0 : index
    %3 = vector.load %arg5[%c0_5, %c0_6] : memref<1x32xf32, #tpu.memory_space<vmem>>, vector<1x32xf32>
    %c0_7 = arith.constant 0 : index
    %c0_8 = arith.constant 0 : index
    %c0_9 = arith.constant 0 : index
    %4 = vector.load %arg1[%c0_7, %c0_8, %c0_9] : memref<8x8x32xbf16, #tpu.memory_space<vmem>>, vector<8x8x32xbf16>
    %5 = vector.shape_cast %4 : vector<8x8x32xbf16> to vector<64x32xbf16>
    %cst = arith.constant dense<0.000000e+00> : vector<64x96xf32>
    %6 = tpu.matmul %5, %0, %cst {dimension_numbers = #tpu.dot_dimension_numbers<[1], [0], [0], [1], [0, 0, 1, 1], [], []>} : vector<64x32xbf16>, vector<32x96xbf16>, vector<64x96xf32> -> vector<64x96xf32>
    %7 = vector.broadcast %2 : vector<1x96xf32> to vector<64x96xf32>
    %8 = arith.addf %6, %7 : vector<64x96xf32>
    %9 = vector.shape_cast %8 : vector<64x96xf32> to vector<8x8x96xf32>
    %c0_10 = arith.constant 0 : index
    %c0_11 = arith.constant 0 : index
    %c0_12 = arith.constant 0 : index
    %10 = vector.load %arg14[%c0_10, %c0_11, %c0_12] : memref<8x8x96xf32, #tpu.memory_space<vmem>>, vector<8x8x96xf32>
    tpu.vector_store %arg14[%c0_10, %c0_11, %c0_12], %9 {strides = array<i32>} : memref<8x8x96xf32, #tpu.memory_space<vmem>>, vector<8x8x96xf32>,
    %11 = vector.shape_cast %3 : vector<1x32xf32> to vector<1x32xf32>
    %12 = vector.broadcast %11 : vector<1x32xf32> to vector<8x32xf32>
    %cst_13 = arith.constant 0.000000e+00 : f32
    %13 = vector.broadcast %cst_13 : f32 to vector<8x32xf32>
    %c0_i32 = arith.constant 0 : i32
    %14 = arith.index_cast %c0_i32 : i32 to index
    %c0_14 = arith.constant 0 : index
    %c0_15 = arith.constant 0 : index
    %15 = vector.load %arg14[%14, %c0_14, %c0_15] : memref<8x8x96xf32, #tpu.memory_space<vmem>>, vector<1x8x96xf32>
    %16 = vector.shape_cast %15 : vector<1x8x96xf32> to vector<8x96xf32>
    %17 = arith.truncf %13 : vector<8x32xf32> to vector<8x32xbf16>
    %cst_16 = arith.constant dense<0.000000e+00> : vector<8x96xf32>
    %18 = tpu.matmul %17, %1, %cst_16 {dimension_numbers = #tpu.dot_dimension_numbers<[1], [0], [0], [1], [0, 0, 1, 1], [], []>} : vector<8x32xbf16>, vector<32x96xbf16>, vector<8x96xf32> -> vector<8x96xf32>
    %19 = vector.extract_strided_slice %16 {offsets = [0, 0], sizes = [8, 64], strides = [1, 1]} : vector<8x96xf32> to vector<8x64xf32>
    %20 = vector.extract_strided_slice %18 {offsets = [0, 0], sizes = [8, 64], strides = [1, 1]} : vector<8x96xf32> to vector<8x64xf32>
    %21 = arith.addf %19, %20 : vector<8x64xf32>
    %22 = arith.negf %21 : vector<8x64xf32>
    %23 = math.exp %22 : vector<8x64xf32>
    %cst_17 = arith.constant 1.000000e+00 : f32
    %24 = vector.broadcast %cst_17 : f32 to vector<8x64xf32>
    %25 = arith.addf %24, %23 : vector<8x64xf32>
    %26 = arith.divf %24, %25 : vector<8x64xf32>
    %27 = vector.extract_strided_slice %26 {offsets = [0, 0], sizes = [8, 32], strides = [1, 1]} : vector<8x64xf32> to vector<8x32xf32>
    %28 = vector.extract_strided_slice %26 {offsets = [0, 32], sizes = [8, 32], strides = [1, 1]} : vector<8x64xf32> to vector<8x32xf32>
    %29 = vector.extract_strided_slice %16 {offsets = [0, 64], sizes = [8, 32], strides = [1, 1]} : vector<8x96xf32> to vector<8x32xf32>
    %30 = vector.extract_strided_slice %18 {offsets = [0, 64], sizes = [8, 32], strides = [1, 1]} : vector<8x96xf32> to vector<8x32xf32>
    %31 = arith.addf %30, %12 : vector<8x32xf32>
    %32 = arith.mulf %27, %31 : vector<8x32xf32>
    %33 = arith.addf %29, %32 : vector<8x32xf32>
    %34 = math.tanh %33 : vector<8x32xf32>
    %cst_18 = arith.constant 1.000000e+00 : f32
    %35 = vector.broadcast %cst_18 : f32 to vector<8x32xf32>
    %36 = arith.subf %35, %28 : vector<8x32xf32>
    %37 = arith.mulf %36, %34 : vector<8x32xf32>
    %38 = arith.mulf %28, %13 : vector<8x32xf32>
    %39 = arith.addf %37, %38 : vector<8x32xf32>
    %40 = arith.truncf %39 : vector<8x32xf32> to vector<8x32xbf16>
    %41 = arith.index_cast %c0_i32 : i32 to index
    %c0_19 = arith.constant 0 : index
    %c0_20 = arith.constant 0 : index
    %42 = vector.load %arg13[%41, %c0_19, %c0_20] : memref<8x8x32xbf16, #tpu.memory_space<vmem>>, vector<1x8x32xbf16>
    %43 = vector.shape_cast %42 : vector<1x8x32xbf16> to vector<8x32xbf16>
    %44 = vector.shape_cast %40 : vector<8x32xbf16> to vector<1x8x32xbf16>
    tpu.vector_store %arg13[%41, %c0_19, %c0_20], %44 {strides = array<i32>} : memref<8x8x32xbf16, #tpu.memory_space<vmem>>, vector<1x8x32xbf16>,
    %c1_i32 = arith.constant 1 : i32
    %45 = arith.index_cast %c1_i32 : i32 to index
    %c0_21 = arith.constant 0 : index
    %c0_22 = arith.constant 0 : index
    %46 = vector.load %arg14[%45, %c0_21, %c0_22] : memref<8x8x96xf32, #tpu.memory_space<vmem>>, vector<1x8x96xf32>
    %47 = vector.shape_cast %46 : vector<1x8x96xf32> to vector<8x96xf32>
    %48 = arith.truncf %39 : vector<8x32xf32> to vector<8x32xbf16>
    %cst_23 = arith.constant dense<0.000000e+00> : vector<8x96xf32>
    %49 = tpu.matmul %48, %1, %cst_23 {dimension_numbers = #tpu.dot_dimension_numbers<[1], [0], [0], [1], [0, 0, 1, 1], [], []>} : vector<8x32xbf16>, vector<32x96xbf16>, vector<8x96xf32> -> vector<8x96xf32>
    %50 = vector.extract_strided_slice %47 {offsets = [0, 0], sizes = [8, 64], strides = [1, 1]} : vector<8x96xf32> to vector<8x64xf32>
    %51 = vector.extract_strided_slice %49 {offsets = [0, 0], sizes = [8, 64], strides = [1, 1]} : vector<8x96xf32> to vector<8x64xf32>
    %52 = arith.addf %50, %51 : vector<8x64xf32>
    %53 = arith.negf %52 : vector<8x64xf32>
    %54 = math.exp %53 : vector<8x64xf32>
    %cst_24 = arith.constant 1.000000e+00 : f32
    %55 = vector.broadcast %cst_24 : f32 to vector<8x64xf32>
    %56 = arith.addf %55, %54 : vector<8x64xf32>
    %57 = arith.divf %55, %56 : vector<8x64xf32>
    %58 = vector.extract_strided_slice %57 {offsets = [0, 0], sizes = [8, 32], strides = [1, 1]} : vector<8x64xf32> to vector<8x32xf32>
    %59 = vector.extract_strided_slice %57 {offsets = [0, 32], sizes = [8, 32], strides = [1, 1]} : vector<8x64xf32> to vector<8x32xf32>
    %60 = vector.extract_strided_slice %47 {offsets = [0, 64], sizes = [8, 32], strides = [1, 1]} : vector<8x96xf32> to vector<8x32xf32>
    %61 = vector.extract_strided_slice %49 {offsets = [0, 64], sizes = [8, 32], strides = [1, 1]} : vector<8x96xf32> to vector<8x32xf32>
    %62 = arith.addf %61, %12 : vector<8x32xf32>
    %63 = arith.mulf %58, %62 : vector<8x32xf32>
    %64 = arith.addf %60, %63 : vector<8x32xf32>
    %65 = math.tanh %64 : vector<8x32xf32>
    %cst_25 = arith.constant 1.000000e+00 : f32
    %66 = vector.broadcast %cst_25 : f32 to vector<8x32xf32>
    %67 = arith.subf %66, %59 : vector<8x32xf32>
    %68 = arith.mulf %67, %65 : vector<8x32xf32>
    %69 = arith.mulf %59, %39 : vector<8x32xf32>
    %70 = arith.addf %68, %69 : vector<8x32xf32>
    %71 = arith.truncf %70 : vector<8x32xf32> to vector<8x32xbf16>
    %72 = arith.index_cast %c1_i32 : i32 to index
    %c0_26 = arith.constant 0 : index
    %c0_27 = arith.constant 0 : index
    %73 = vector.load %arg13[%72, %c0_26, %c0_27] : memref<8x8x32xbf16, #tpu.memory_space<vmem>>, vector<1x8x32xbf16>
    %74 = vector.shape_cast %73 : vector<1x8x32xbf16> to vector<8x32xbf16>
    %75 = vector.shape_cast %71 : vector<8x32xbf16> to vector<1x8x32xbf16>
    tpu.vector_store %arg13[%72, %c0_26, %c0_27], %75 {strides = array<i32>} : memref<8x8x32xbf16, #tpu.memory_space<vmem>>, vector<1x8x32xbf16>,
    %c2_i32 = arith.constant 2 : i32
    %76 = arith.index_cast %c2_i32 : i32 to index
    %c0_28 = arith.constant 0 : index
    %c0_29 = arith.constant 0 : index
    %77 = vector.load %arg14[%76, %c0_28, %c0_29] : memref<8x8x96xf32, #tpu.memory_space<vmem>>, vector<1x8x96xf32>
    %78 = vector.shape_cast %77 : vector<1x8x96xf32> to vector<8x96xf32>
    %79 = arith.truncf %70 : vector<8x32xf32> to vector<8x32xbf16>
    %cst_30 = arith.constant dense<0.000000e+00> : vector<8x96xf32>
    %80 = tpu.matmul %79, %1, %cst_30 {dimension_numbers = #tpu.dot_dimension_numbers<[1], [0], [0], [1], [0, 0, 1, 1], [], []>} : vector<8x32xbf16>, vector<32x96xbf16>, vector<8x96xf32> -> vector<8x96xf32>
    %81 = vector.extract_strided_slice %78 {offsets = [0, 0], sizes = [8, 64], strides = [1, 1]} : vector<8x96xf32> to vector<8x64xf32>
    %82 = vector.extract_strided_slice %80 {offsets = [0, 0], sizes = [8, 64], strides = [1, 1]} : vector<8x96xf32> to vector<8x64xf32>
    %83 = arith.addf %81, %82 : vector<8x64xf32>
    %84 = arith.negf %83 : vector<8x64xf32>
    %85 = math.exp %84 : vector<8x64xf32>
    %cst_31 = arith.constant 1.000000e+00 : f32
    %86 = vector.broadcast %cst_31 : f32 to vector<8x64xf32>
    %87 = arith.addf %86, %85 : vector<8x64xf32>
    %88 = arith.divf %86, %87 : vector<8x64xf32>
    %89 = vector.extract_strided_slice %88 {offsets = [0, 0], sizes = [8, 32], strides = [1, 1]} : vector<8x64xf32> to vector<8x32xf32>
    %90 = vector.extract_strided_slice %88 {offsets = [0, 32], sizes = [8, 32], strides = [1, 1]} : vector<8x64xf32> to vector<8x32xf32>
    %91 = vector.extract_strided_slice %78 {offsets = [0, 64], sizes = [8, 32], strides = [1, 1]} : vector<8x96xf32> to vector<8x32xf32>
    %92 = vector.extract_strided_slice %80 {offsets = [0, 64], sizes = [8, 32], strides = [1, 1]} : vector<8x96xf32> to vector<8x32xf32>
    %93 = arith.addf %92, %12 : vector<8x32xf32>
    %94 = arith.mulf %89, %93 : vector<8x32xf32>
    %95 = arith.addf %91, %94 : vector<8x32xf32>
    %96 = math.tanh %95 : vector<8x32xf32>
    %cst_32 = arith.constant 1.000000e+00 : f32
    %97 = vector.broadcast %cst_32 : f32 to vector<8x32xf32>
    %98 = arith.subf %97, %90 : vector<8x32xf32>
    %99 = arith.mulf %98, %96 : vector<8x32xf32>
    %100 = arith.mulf %90, %70 : vector<8x32xf32>
    %101 = arith.addf %99, %100 : vector<8x32xf32>
    %102 = arith.truncf %101 : vector<8x32xf32> to vector<8x32xbf16>
    %103 = arith.index_cast %c2_i32 : i32 to index
    %c0_33 = arith.constant 0 : index
    %c0_34 = arith.constant 0 : index
    %104 = vector.load %arg13[%103, %c0_33, %c0_34] : memref<8x8x32xbf16, #tpu.memory_space<vmem>>, vector<1x8x32xbf16>
    %105 = vector.shape_cast %104 : vector<1x8x32xbf16> to vector<8x32xbf16>
    %106 = vector.shape_cast %102 : vector<8x32xbf16> to vector<1x8x32xbf16>
    tpu.vector_store %arg13[%103, %c0_33, %c0_34], %106 {strides = array<i32>} : memref<8x8x32xbf16, #tpu.memory_space<vmem>>, vector<1x8x32xbf16>,
    %c3_i32 = arith.constant 3 : i32
    %107 = arith.index_cast %c3_i32 : i32 to index
    %c0_35 = arith.constant 0 : index
    %c0_36 = arith.constant 0 : index
    %108 = vector.load %arg14[%107, %c0_35, %c0_36] : memref<8x8x96xf32, #tpu.memory_space<vmem>>, vector<1x8x96xf32>
    %109 = vector.shape_cast %108 : vector<1x8x96xf32> to vector<8x96xf32>
    %110 = arith.truncf %101 : vector<8x32xf32> to vector<8x32xbf16>
    %cst_37 = arith.constant dense<0.000000e+00> : vector<8x96xf32>
    %111 = tpu.matmul %110, %1, %cst_37 {dimension_numbers = #tpu.dot_dimension_numbers<[1], [0], [0], [1], [0, 0, 1, 1], [], []>} : vector<8x32xbf16>, vector<32x96xbf16>, vector<8x96xf32> -> vector<8x96xf32>
    %112 = vector.extract_strided_slice %109 {offsets = [0, 0], sizes = [8, 64], strides = [1, 1]} : vector<8x96xf32> to vector<8x64xf32>
    %113 = vector.extract_strided_slice %111 {offsets = [0, 0], sizes = [8, 64], strides = [1, 1]} : vector<8x96xf32> to vector<8x64xf32>
    %114 = arith.addf %112, %113 : vector<8x64xf32>
    %115 = arith.negf %114 : vector<8x64xf32>
    %116 = math.exp %115 : vector<8x64xf32>
    %cst_38 = arith.constant 1.000000e+00 : f32
    %117 = vector.broadcast %cst_38 : f32 to vector<8x64xf32>
    %118 = arith.addf %117, %116 : vector<8x64xf32>
    %119 = arith.divf %117, %118 : vector<8x64xf32>
    %120 = vector.extract_strided_slice %119 {offsets = [0, 0], sizes = [8, 32], strides = [1, 1]} : vector<8x64xf32> to vector<8x32xf32>
    %121 = vector.extract_strided_slice %119 {offsets = [0, 32], sizes = [8, 32], strides = [1, 1]} : vector<8x64xf32> to vector<8x32xf32>
    %122 = vector.extract_strided_slice %109 {offsets = [0, 64], sizes = [8, 32], strides = [1, 1]} : vector<8x96xf32> to vector<8x32xf32>
    %123 = vector.extract_strided_slice %111 {offsets = [0, 64], sizes = [8, 32], strides = [1, 1]} : vector<8x96xf32> to vector<8x32xf32>
    %124 = arith.addf %123, %12 : vector<8x32xf32>
    %125 = arith.mulf %120, %124 : vector<8x32xf32>
    %126 = arith.addf %122, %125 : vector<8x32xf32>
    %127 = math.tanh %126 : vector<8x32xf32>
    %cst_39 = arith.constant 1.000000e+00 : f32
    %128 = vector.broadcast %cst_39 : f32 to vector<8x32xf32>
    %129 = arith.subf %128, %121 : vector<8x32xf32>
    %130 = arith.mulf %129, %127 : vector<8x32xf32>
    %131 = arith.mulf %121, %101 : vector<8x32xf32>
    %132 = arith.addf %130, %131 : vector<8x32xf32>
    %133 = arith.truncf %132 : vector<8x32xf32> to vector<8x32xbf16>
    %134 = arith.index_cast %c3_i32 : i32 to index
    %c0_40 = arith.constant 0 : index
    %c0_41 = arith.constant 0 : index
    %135 = vector.load %arg13[%134, %c0_40, %c0_41] : memref<8x8x32xbf16, #tpu.memory_space<vmem>>, vector<1x8x32xbf16>
    %136 = vector.shape_cast %135 : vector<1x8x32xbf16> to vector<8x32xbf16>
    %137 = vector.shape_cast %133 : vector<8x32xbf16> to vector<1x8x32xbf16>
    tpu.vector_store %arg13[%134, %c0_40, %c0_41], %137 {strides = array<i32>} : memref<8x8x32xbf16, #tpu.memory_space<vmem>>, vector<1x8x32xbf16>,
    %c4_i32 = arith.constant 4 : i32
    %138 = arith.index_cast %c4_i32 : i32 to index
    %c0_42 = arith.constant 0 : index
    %c0_43 = arith.constant 0 : index
    %139 = vector.load %arg14[%138, %c0_42, %c0_43] : memref<8x8x96xf32, #tpu.memory_space<vmem>>, vector<1x8x96xf32>
    %140 = vector.shape_cast %139 : vector<1x8x96xf32> to vector<8x96xf32>
    %141 = arith.truncf %132 : vector<8x32xf32> to vector<8x32xbf16>
    %cst_44 = arith.constant dense<0.000000e+00> : vector<8x96xf32>
    %142 = tpu.matmul %141, %1, %cst_44 {dimension_numbers = #tpu.dot_dimension_numbers<[1], [0], [0], [1], [0, 0, 1, 1], [], []>} : vector<8x32xbf16>, vector<32x96xbf16>, vector<8x96xf32> -> vector<8x96xf32>
    %143 = vector.extract_strided_slice %140 {offsets = [0, 0], sizes = [8, 64], strides = [1, 1]} : vector<8x96xf32> to vector<8x64xf32>
    %144 = vector.extract_strided_slice %142 {offsets = [0, 0], sizes = [8, 64], strides = [1, 1]} : vector<8x96xf32> to vector<8x64xf32>
    %145 = arith.addf %143, %144 : vector<8x64xf32>
    %146 = arith.negf %145 : vector<8x64xf32>
    %147 = math.exp %146 : vector<8x64xf32>
    %cst_45 = arith.constant 1.000000e+00 : f32
    %148 = vector.broadcast %cst_45 : f32 to vector<8x64xf32>
    %149 = arith.addf %148, %147 : vector<8x64xf32>
    %150 = arith.divf %148, %149 : vector<8x64xf32>
    %151 = vector.extract_strided_slice %150 {offsets = [0, 0], sizes = [8, 32], strides = [1, 1]} : vector<8x64xf32> to vector<8x32xf32>
    %152 = vector.extract_strided_slice %150 {offsets = [0, 32], sizes = [8, 32], strides = [1, 1]} : vector<8x64xf32> to vector<8x32xf32>
    %153 = vector.extract_strided_slice %140 {offsets = [0, 64], sizes = [8, 32], strides = [1, 1]} : vector<8x96xf32> to vector<8x32xf32>
    %154 = vector.extract_strided_slice %142 {offsets = [0, 64], sizes = [8, 32], strides = [1, 1]} : vector<8x96xf32> to vector<8x32xf32>
    %155 = arith.addf %154, %12 : vector<8x32xf32>
    %156 = arith.mulf %151, %155 : vector<8x32xf32>
    %157 = arith.addf %153, %156 : vector<8x32xf32>
    %158 = math.tanh %157 : vector<8x32xf32>
    %cst_46 = arith.constant 1.000000e+00 : f32
    %159 = vector.broadcast %cst_46 : f32 to vector<8x32xf32>
    %160 = arith.subf %159, %152 : vector<8x32xf32>
    %161 = arith.mulf %160, %158 : vector<8x32xf32>
    %162 = arith.mulf %152, %132 : vector<8x32xf32>
    %163 = arith.addf %161, %162 : vector<8x32xf32>
    %164 = arith.truncf %163 : vector<8x32xf32> to vector<8x32xbf16>
    %165 = arith.index_cast %c4_i32 : i32 to index
    %c0_47 = arith.constant 0 : index
    %c0_48 = arith.constant 0 : index
    %166 = vector.load %arg13[%165, %c0_47, %c0_48] : memref<8x8x32xbf16, #tpu.memory_space<vmem>>, vector<1x8x32xbf16>
    %167 = vector.shape_cast %166 : vector<1x8x32xbf16> to vector<8x32xbf16>
    %168 = vector.shape_cast %164 : vector<8x32xbf16> to vector<1x8x32xbf16>
    tpu.vector_store %arg13[%165, %c0_47, %c0_48], %168 {strides = array<i32>} : memref<8x8x32xbf16, #tpu.memory_space<vmem>>, vector<1x8x32xbf16>,
    %c5_i32 = arith.constant 5 : i32
    %169 = arith.index_cast %c5_i32 : i32 to index
    %c0_49 = arith.constant 0 : index
    %c0_50 = arith.constant 0 : index
    %170 = vector.load %arg14[%169, %c0_49, %c0_50] : memref<8x8x96xf32, #tpu.memory_space<vmem>>, vector<1x8x96xf32>
    %171 = vector.shape_cast %170 : vector<1x8x96xf32> to vector<8x96xf32>
    %172 = arith.truncf %163 : vector<8x32xf32> to vector<8x32xbf16>
    %cst_51 = arith.constant dense<0.000000e+00> : vector<8x96xf32>
    %173 = tpu.matmul %172, %1, %cst_51 {dimension_numbers = #tpu.dot_dimension_numbers<[1], [0], [0], [1], [0, 0, 1, 1], [], []>} : vector<8x32xbf16>, vector<32x96xbf16>, vector<8x96xf32> -> vector<8x96xf32>
    %174 = vector.extract_strided_slice %171 {offsets = [0, 0], sizes = [8, 64], strides = [1, 1]} : vector<8x96xf32> to vector<8x64xf32>
    %175 = vector.extract_strided_slice %173 {offsets = [0, 0], sizes = [8, 64], strides = [1, 1]} : vector<8x96xf32> to vector<8x64xf32>
    %176 = arith.addf %174, %175 : vector<8x64xf32>
    %177 = arith.negf %176 : vector<8x64xf32>
    %178 = math.exp %177 : vector<8x64xf32>
    %cst_52 = arith.constant 1.000000e+00 : f32
    %179 = vector.broadcast %cst_52 : f32 to vector<8x64xf32>
    %180 = arith.addf %179, %178 : vector<8x64xf32>
    %181 = arith.divf %179, %180 : vector<8x64xf32>
    %182 = vector.extract_strided_slice %181 {offsets = [0, 0], sizes = [8, 32], strides = [1, 1]} : vector<8x64xf32> to vector<8x32xf32>
    %183 = vector.extract_strided_slice %181 {offsets = [0, 32], sizes = [8, 32], strides = [1, 1]} : vector<8x64xf32> to vector<8x32xf32>
    %184 = vector.extract_strided_slice %171 {offsets = [0, 64], sizes = [8, 32], strides = [1, 1]} : vector<8x96xf32> to vector<8x32xf32>
    %185 = vector.extract_strided_slice %173 {offsets = [0, 64], sizes = [8, 32], strides = [1, 1]} : vector<8x96xf32> to vector<8x32xf32>
    %186 = arith.addf %185, %12 : vector<8x32xf32>
    %187 = arith.mulf %182, %186 : vector<8x32xf32>
    %188 = arith.addf %184, %187 : vector<8x32xf32>
    %189 = math.tanh %188 : vector<8x32xf32>
    %cst_53 = arith.constant 1.000000e+00 : f32
    %190 = vector.broadcast %cst_53 : f32 to vector<8x32xf32>
    %191 = arith.subf %190, %183 : vector<8x32xf32>
    %192 = arith.mulf %191, %189 : vector<8x32xf32>
    %193 = arith.mulf %183, %163 : vector<8x32xf32>
    %194 = arith.addf %192, %193 : vector<8x32xf32>
    %195 = arith.truncf %194 : vector<8x32xf32> to vector<8x32xbf16>
    %196 = arith.index_cast %c5_i32 : i32 to index
    %c0_54 = arith.constant 0 : index
    %c0_55 = arith.constant 0 : index
    %197 = vector.load %arg13[%196, %c0_54, %c0_55] : memref<8x8x32xbf16, #tpu.memory_space<vmem>>, vector<1x8x32xbf16>
    %198 = vector.shape_cast %197 : vector<1x8x32xbf16> to vector<8x32xbf16>
    %199 = vector.shape_cast %195 : vector<8x32xbf16> to vector<1x8x32xbf16>
    tpu.vector_store %arg13[%196, %c0_54, %c0_55], %199 {strides = array<i32>} : memref<8x8x32xbf16, #tpu.memory_space<vmem>>, vector<1x8x32xbf16>,
    %c6_i32 = arith.constant 6 : i32
    %200 = arith.index_cast %c6_i32 : i32 to index
    %c0_56 = arith.constant 0 : index
    %c0_57 = arith.constant 0 : index
    %201 = vector.load %arg14[%200, %c0_56, %c0_57] : memref<8x8x96xf32, #tpu.memory_space<vmem>>, vector<1x8x96xf32>
    %202 = vector.shape_cast %201 : vector<1x8x96xf32> to vector<8x96xf32>
    %203 = arith.truncf %194 : vector<8x32xf32> to vector<8x32xbf16>
    %cst_58 = arith.constant dense<0.000000e+00> : vector<8x96xf32>
    %204 = tpu.matmul %203, %1, %cst_58 {dimension_numbers = #tpu.dot_dimension_numbers<[1], [0], [0], [1], [0, 0, 1, 1], [], []>} : vector<8x32xbf16>, vector<32x96xbf16>, vector<8x96xf32> -> vector<8x96xf32>
    %205 = vector.extract_strided_slice %202 {offsets = [0, 0], sizes = [8, 64], strides = [1, 1]} : vector<8x96xf32> to vector<8x64xf32>
    %206 = vector.extract_strided_slice %204 {offsets = [0, 0], sizes = [8, 64], strides = [1, 1]} : vector<8x96xf32> to vector<8x64xf32>
    %207 = arith.addf %205, %206 : vector<8x64xf32>
    %208 = arith.negf %207 : vector<8x64xf32>
    %209 = math.exp %208 : vector<8x64xf32>
    %cst_59 = arith.constant 1.000000e+00 : f32
    %210 = vector.broadcast %cst_59 : f32 to vector<8x64xf32>
    %211 = arith.addf %210, %209 : vector<8x64xf32>
    %212 = arith.divf %210, %211 : vector<8x64xf32>
    %213 = vector.extract_strided_slice %212 {offsets = [0, 0], sizes = [8, 32], strides = [1, 1]} : vector<8x64xf32> to vector<8x32xf32>
    %214 = vector.extract_strided_slice %212 {offsets = [0, 32], sizes = [8, 32], strides = [1, 1]} : vector<8x64xf32> to vector<8x32xf32>
    %215 = vector.extract_strided_slice %202 {offsets = [0, 64], sizes = [8, 32], strides = [1, 1]} : vector<8x96xf32> to vector<8x32xf32>
    %216 = vector.extract_strided_slice %204 {offsets = [0, 64], sizes = [8, 32], strides = [1, 1]} : vector<8x96xf32> to vector<8x32xf32>
    %217 = arith.addf %216, %12 : vector<8x32xf32>
    %218 = arith.mulf %213, %217 : vector<8x32xf32>
    %219 = arith.addf %215, %218 : vector<8x32xf32>
    %220 = math.tanh %219 : vector<8x32xf32>
    %cst_60 = arith.constant 1.000000e+00 : f32
    %221 = vector.broadcast %cst_60 : f32 to vector<8x32xf32>
    %222 = arith.subf %221, %214 : vector<8x32xf32>
    %223 = arith.mulf %222, %220 : vector<8x32xf32>
    %224 = arith.mulf %214, %194 : vector<8x32xf32>
    %225 = arith.addf %223, %224 : vector<8x32xf32>
    %226 = arith.truncf %225 : vector<8x32xf32> to vector<8x32xbf16>
    %227 = arith.index_cast %c6_i32 : i32 to index
    %c0_61 = arith.constant 0 : index
    %c0_62 = arith.constant 0 : index
    %228 = vector.load %arg13[%227, %c0_61, %c0_62] : memref<8x8x32xbf16, #tpu.memory_space<vmem>>, vector<1x8x32xbf16>
    %229 = vector.shape_cast %228 : vector<1x8x32xbf16> to vector<8x32xbf16>
    %230 = vector.shape_cast %226 : vector<8x32xbf16> to vector<1x8x32xbf16>
    tpu.vector_store %arg13[%227, %c0_61, %c0_62], %230 {strides = array<i32>} : memref<8x8x32xbf16, #tpu.memory_space<vmem>>, vector<1x8x32xbf16>,
    %c7_i32 = arith.constant 7 : i32
    %231 = arith.index_cast %c7_i32 : i32 to index
    %c0_63 = arith.constant 0 : index
    %c0_64 = arith.constant 0 : index
    %232 = vector.load %arg14[%231, %c0_63, %c0_64] : memref<8x8x96xf32, #tpu.memory_space<vmem>>, vector<1x8x96xf32>
    %233 = vector.shape_cast %232 : vector<1x8x96xf32> to vector<8x96xf32>
    %234 = arith.truncf %225 : vector<8x32xf32> to vector<8x32xbf16>
    %cst_65 = arith.constant dense<0.000000e+00> : vector<8x96xf32>
    %235 = tpu.matmul %234, %1, %cst_65 {dimension_numbers = #tpu.dot_dimension_numbers<[1], [0], [0], [1], [0, 0, 1, 1], [], []>} : vector<8x32xbf16>, vector<32x96xbf16>, vector<8x96xf32> -> vector<8x96xf32>
    %236 = vector.extract_strided_slice %233 {offsets = [0, 0], sizes = [8, 64], strides = [1, 1]} : vector<8x96xf32> to vector<8x64xf32>
    %237 = vector.extract_strided_slice %235 {offsets = [0, 0], sizes = [8, 64], strides = [1, 1]} : vector<8x96xf32> to vector<8x64xf32>
    %238 = arith.addf %236, %237 : vector<8x64xf32>
    %239 = arith.negf %238 : vector<8x64xf32>
    %240 = math.exp %239 : vector<8x64xf32>
    %cst_66 = arith.constant 1.000000e+00 : f32
    %241 = vector.broadcast %cst_66 : f32 to vector<8x64xf32>
    %242 = arith.addf %241, %240 : vector<8x64xf32>
    %243 = arith.divf %241, %242 : vector<8x64xf32>
    %244 = vector.extract_strided_slice %243 {offsets = [0, 0], sizes = [8, 32], strides = [1, 1]} : vector<8x64xf32> to vector<8x32xf32>
    %245 = vector.extract_strided_slice %243 {offsets = [0, 32], sizes = [8, 32], strides = [1, 1]} : vector<8x64xf32> to vector<8x32xf32>
    %246 = vector.extract_strided_slice %233 {offsets = [0, 64], sizes = [8, 32], strides = [1, 1]} : vector<8x96xf32> to vector<8x32xf32>
    %247 = vector.extract_strided_slice %235 {offsets = [0, 64], sizes = [8, 32], strides = [1, 1]} : vector<8x96xf32> to vector<8x32xf32>
    %248 = arith.addf %247, %12 : vector<8x32xf32>
    %249 = arith.mulf %244, %248 : vector<8x32xf32>
    %250 = arith.addf %246, %249 : vector<8x32xf32>
    %251 = math.tanh %250 : vector<8x32xf32>
    %cst_67 = arith.constant 1.000000e+00 : f32
    %252 = vector.broadcast %cst_67 : f32 to vector<8x32xf32>
    %253 = arith.subf %252, %245 : vector<8x32xf32>
    %254 = arith.mulf %253, %251 : vector<8x32xf32>
    %255 = arith.mulf %245, %225 : vector<8x32xf32>
    %256 = arith.addf %254, %255 : vector<8x32xf32>
    %257 = arith.truncf %256 : vector<8x32xf32> to vector<8x32xbf16>
    %258 = arith.index_cast %c7_i32 : i32 to index
    %c0_68 = arith.constant 0 : index
    %c0_69 = arith.constant 0 : index
    %259 = vector.load %arg13[%258, %c0_68, %c0_69] : memref<8x8x32xbf16, #tpu.memory_space<vmem>>, vector<1x8x32xbf16>
    %260 = vector.shape_cast %259 : vector<1x8x32xbf16> to vector<8x32xbf16>
    %261 = vector.shape_cast %257 : vector<8x32xbf16> to vector<1x8x32xbf16>
    tpu.vector_store %arg13[%258, %c0_68, %c0_69], %261 {strides = array<i32>} : memref<8x8x32xbf16, #tpu.memory_space<vmem>>, vector<1x8x32xbf16>,
    %c8_i32 = arith.constant 8 : i32
    %c0_70 = arith.constant 0 : index
    %c0_71 = arith.constant 0 : index
    %262 = vector.load %arg6[%c0_70, %c0_71] : memref<32x96xbf16, #tpu.memory_space<vmem>>, vector<32x96xbf16>
    %c0_72 = arith.constant 0 : index
    %c0_73 = arith.constant 0 : index
    %263 = vector.load %arg7[%c0_72, %c0_73] : memref<32x96xbf16, #tpu.memory_space<vmem>>, vector<32x96xbf16>
    %c0_74 = arith.constant 0 : index
    %c0_75 = arith.constant 0 : index
    %264 = vector.load %arg8[%c0_74, %c0_75] : memref<1x96xf32, #tpu.memory_space<vmem>>, vector<1x96xf32>
    %c0_76 = arith.constant 0 : index
    %c0_77 = arith.constant 0 : index
    %265 = vector.load %arg9[%c0_76, %c0_77] : memref<1x32xf32, #tpu.memory_space<vmem>>, vector<1x32xf32>
    %c0_78 = arith.constant 0 : index
    %c0_79 = arith.constant 0 : index
    %c0_80 = arith.constant 0 : index
    %266 = vector.load %arg13[%c0_78, %c0_79, %c0_80] : memref<8x8x32xbf16, #tpu.memory_space<vmem>>, vector<8x8x32xbf16>
    %267 = vector.shape_cast %266 : vector<8x8x32xbf16> to vector<64x32xbf16>
    %cst_81 = arith.constant dense<0.000000e+00> : vector<64x96xf32>
    %268 = tpu.matmul %267, %262, %cst_81 {dimension_numbers = #tpu.dot_dimension_numbers<[1], [0], [0], [1], [0, 0, 1, 1], [], []>} : vector<64x32xbf16>, vector<32x96xbf16>, vector<64x96xf32> -> vector<64x96xf32>
    %269 = vector.broadcast %264 : vector<1x96xf32> to vector<64x96xf32>
    %270 = arith.addf %268, %269 : vector<64x96xf32>
    %271 = vector.shape_cast %270 : vector<64x96xf32> to vector<8x8x96xf32>
    %c0_82 = arith.constant 0 : index
    %c0_83 = arith.constant 0 : index
    %c0_84 = arith.constant 0 : index
    %272 = vector.load %arg14[%c0_82, %c0_83, %c0_84] : memref<8x8x96xf32, #tpu.memory_space<vmem>>, vector<8x8x96xf32>
    tpu.vector_store %arg14[%c0_82, %c0_83, %c0_84], %271 {strides = array<i32>} : memref<8x8x96xf32, #tpu.memory_space<vmem>>, vector<8x8x96xf32>,
    %273 = vector.shape_cast %265 : vector<1x32xf32> to vector<1x32xf32>
    %274 = vector.broadcast %273 : vector<1x32xf32> to vector<8x32xf32>
    %cst_85 = arith.constant 0.000000e+00 : f32
    %275 = vector.broadcast %cst_85 : f32 to vector<8x32xf32>
    %c0_i32_86 = arith.constant 0 : i32
    %276 = arith.index_cast %c0_i32_86 : i32 to index
    %c0_87 = arith.constant 0 : index
    %c0_88 = arith.constant 0 : index
    %277 = vector.load %arg14[%276, %c0_87, %c0_88] : memref<8x8x96xf32, #tpu.memory_space<vmem>>, vector<1x8x96xf32>
    %278 = vector.shape_cast %277 : vector<1x8x96xf32> to vector<8x96xf32>
    %279 = arith.truncf %275 : vector<8x32xf32> to vector<8x32xbf16>
    %cst_89 = arith.constant dense<0.000000e+00> : vector<8x96xf32>
    %280 = tpu.matmul %279, %263, %cst_89 {dimension_numbers = #tpu.dot_dimension_numbers<[1], [0], [0], [1], [0, 0, 1, 1], [], []>} : vector<8x32xbf16>, vector<32x96xbf16>, vector<8x96xf32> -> vector<8x96xf32>
    %281 = vector.extract_strided_slice %278 {offsets = [0, 0], sizes = [8, 64], strides = [1, 1]} : vector<8x96xf32> to vector<8x64xf32>
    %282 = vector.extract_strided_slice %280 {offsets = [0, 0], sizes = [8, 64], strides = [1, 1]} : vector<8x96xf32> to vector<8x64xf32>
    %283 = arith.addf %281, %282 : vector<8x64xf32>
    %284 = arith.negf %283 : vector<8x64xf32>
    %285 = math.exp %284 : vector<8x64xf32>
    %cst_90 = arith.constant 1.000000e+00 : f32
    %286 = vector.broadcast %cst_90 : f32 to vector<8x64xf32>
    %287 = arith.addf %286, %285 : vector<8x64xf32>
    %288 = arith.divf %286, %287 : vector<8x64xf32>
    %289 = vector.extract_strided_slice %288 {offsets = [0, 0], sizes = [8, 32], strides = [1, 1]} : vector<8x64xf32> to vector<8x32xf32>
    %290 = vector.extract_strided_slice %288 {offsets = [0, 32], sizes = [8, 32], strides = [1, 1]} : vector<8x64xf32> to vector<8x32xf32>
    %291 = vector.extract_strided_slice %278 {offsets = [0, 64], sizes = [8, 32], strides = [1, 1]} : vector<8x96xf32> to vector<8x32xf32>
    %292 = vector.extract_strided_slice %280 {offsets = [0, 64], sizes = [8, 32], strides = [1, 1]} : vector<8x96xf32> to vector<8x32xf32>
    %293 = arith.addf %292, %274 : vector<8x32xf32>
    %294 = arith.mulf %289, %293 : vector<8x32xf32>
    %295 = arith.addf %291, %294 : vector<8x32xf32>
    %296 = math.tanh %295 : vector<8x32xf32>
    %cst_91 = arith.constant 1.000000e+00 : f32
    %297 = vector.broadcast %cst_91 : f32 to vector<8x32xf32>
    %298 = arith.subf %297, %290 : vector<8x32xf32>
    %299 = arith.mulf %298, %296 : vector<8x32xf32>
    %300 = arith.mulf %290, %275 : vector<8x32xf32>
    %301 = arith.addf %299, %300 : vector<8x32xf32>
    %c1_i32_92 = arith.constant 1 : i32
    %302 = arith.index_cast %c1_i32_92 : i32 to index
    %c0_93 = arith.constant 0 : index
    %c0_94 = arith.constant 0 : index
    %303 = vector.load %arg14[%302, %c0_93, %c0_94] : memref<8x8x96xf32, #tpu.memory_space<vmem>>, vector<1x8x96xf32>
    %304 = vector.shape_cast %303 : vector<1x8x96xf32> to vector<8x96xf32>
    %305 = arith.truncf %301 : vector<8x32xf32> to vector<8x32xbf16>
    %cst_95 = arith.constant dense<0.000000e+00> : vector<8x96xf32>
    %306 = tpu.matmul %305, %263, %cst_95 {dimension_numbers = #tpu.dot_dimension_numbers<[1], [0], [0], [1], [0, 0, 1, 1], [], []>} : vector<8x32xbf16>, vector<32x96xbf16>, vector<8x96xf32> -> vector<8x96xf32>
    %307 = vector.extract_strided_slice %304 {offsets = [0, 0], sizes = [8, 64], strides = [1, 1]} : vector<8x96xf32> to vector<8x64xf32>
    %308 = vector.extract_strided_slice %306 {offsets = [0, 0], sizes = [8, 64], strides = [1, 1]} : vector<8x96xf32> to vector<8x64xf32>
    %309 = arith.addf %307, %308 : vector<8x64xf32>
    %310 = arith.negf %309 : vector<8x64xf32>
    %311 = math.exp %310 : vector<8x64xf32>
    %cst_96 = arith.constant 1.000000e+00 : f32
    %312 = vector.broadcast %cst_96 : f32 to vector<8x64xf32>
    %313 = arith.addf %312, %311 : vector<8x64xf32>
    %314 = arith.divf %312, %313 : vector<8x64xf32>
    %315 = vector.extract_strided_slice %314 {offsets = [0, 0], sizes = [8, 32], strides = [1, 1]} : vector<8x64xf32> to vector<8x32xf32>
    %316 = vector.extract_strided_slice %314 {offsets = [0, 32], sizes = [8, 32], strides = [1, 1]} : vector<8x64xf32> to vector<8x32xf32>
    %317 = vector.extract_strided_slice %304 {offsets = [0, 64], sizes = [8, 32], strides = [1, 1]} : vector<8x96xf32> to vector<8x32xf32>
    %318 = vector.extract_strided_slice %306 {offsets = [0, 64], sizes = [8, 32], strides = [1, 1]} : vector<8x96xf32> to vector<8x32xf32>
    %319 = arith.addf %318, %274 : vector<8x32xf32>
    %320 = arith.mulf %315, %319 : vector<8x32xf32>
    %321 = arith.addf %317, %320 : vector<8x32xf32>
    %322 = math.tanh %321 : vector<8x32xf32>
    %cst_97 = arith.constant 1.000000e+00 : f32
    %323 = vector.broadcast %cst_97 : f32 to vector<8x32xf32>
    %324 = arith.subf %323, %316 : vector<8x32xf32>
    %325 = arith.mulf %324, %322 : vector<8x32xf32>
    %326 = arith.mulf %316, %301 : vector<8x32xf32>
    %327 = arith.addf %325, %326 : vector<8x32xf32>
    %c2_i32_98 = arith.constant 2 : i32
    %328 = arith.index_cast %c2_i32_98 : i32 to index
    %c0_99 = arith.constant 0 : index
    %c0_100 = arith.constant 0 : index
    %329 = vector.load %arg14[%328, %c0_99, %c0_100] : memref<8x8x96xf32, #tpu.memory_space<vmem>>, vector<1x8x96xf32>
    %330 = vector.shape_cast %329 : vector<1x8x96xf32> to vector<8x96xf32>
    %331 = arith.truncf %327 : vector<8x32xf32> to vector<8x32xbf16>
    %cst_101 = arith.constant dense<0.000000e+00> : vector<8x96xf32>
    %332 = tpu.matmul %331, %263, %cst_101 {dimension_numbers = #tpu.dot_dimension_numbers<[1], [0], [0], [1], [0, 0, 1, 1], [], []>} : vector<8x32xbf16>, vector<32x96xbf16>, vector<8x96xf32> -> vector<8x96xf32>
    %333 = vector.extract_strided_slice %330 {offsets = [0, 0], sizes = [8, 64], strides = [1, 1]} : vector<8x96xf32> to vector<8x64xf32>
    %334 = vector.extract_strided_slice %332 {offsets = [0, 0], sizes = [8, 64], strides = [1, 1]} : vector<8x96xf32> to vector<8x64xf32>
    %335 = arith.addf %333, %334 : vector<8x64xf32>
    %336 = arith.negf %335 : vector<8x64xf32>
    %337 = math.exp %336 : vector<8x64xf32>
    %cst_102 = arith.constant 1.000000e+00 : f32
    %338 = vector.broadcast %cst_102 : f32 to vector<8x64xf32>
    %339 = arith.addf %338, %337 : vector<8x64xf32>
    %340 = arith.divf %338, %339 : vector<8x64xf32>
    %341 = vector.extract_strided_slice %340 {offsets = [0, 0], sizes = [8, 32], strides = [1, 1]} : vector<8x64xf32> to vector<8x32xf32>
    %342 = vector.extract_strided_slice %340 {offsets = [0, 32], sizes = [8, 32], strides = [1, 1]} : vector<8x64xf32> to vector<8x32xf32>
    %343 = vector.extract_strided_slice %330 {offsets = [0, 64], sizes = [8, 32], strides = [1, 1]} : vector<8x96xf32> to vector<8x32xf32>
    %344 = vector.extract_strided_slice %332 {offsets = [0, 64], sizes = [8, 32], strides = [1, 1]} : vector<8x96xf32> to vector<8x32xf32>
    %345 = arith.addf %344, %274 : vector<8x32xf32>
    %346 = arith.mulf %341, %345 : vector<8x32xf32>
    %347 = arith.addf %343, %346 : vector<8x32xf32>
    %348 = math.tanh %347 : vector<8x32xf32>
    %cst_103 = arith.constant 1.000000e+00 : f32
    %349 = vector.broadcast %cst_103 : f32 to vector<8x32xf32>
    %350 = arith.subf %349, %342 : vector<8x32xf32>
    %351 = arith.mulf %350, %348 : vector<8x32xf32>
    %352 = arith.mulf %342, %327 : vector<8x32xf32>
    %353 = arith.addf %351, %352 : vector<8x32xf32>
    %c3_i32_104 = arith.constant 3 : i32
    %354 = arith.index_cast %c3_i32_104 : i32 to index
    %c0_105 = arith.constant 0 : index
    %c0_106 = arith.constant 0 : index
    %355 = vector.load %arg14[%354, %c0_105, %c0_106] : memref<8x8x96xf32, #tpu.memory_space<vmem>>, vector<1x8x96xf32>
    %356 = vector.shape_cast %355 : vector<1x8x96xf32> to vector<8x96xf32>
    %357 = arith.truncf %353 : vector<8x32xf32> to vector<8x32xbf16>
    %cst_107 = arith.constant dense<0.000000e+00> : vector<8x96xf32>
    %358 = tpu.matmul %357, %263, %cst_107 {dimension_numbers = #tpu.dot_dimension_numbers<[1], [0], [0], [1], [0, 0, 1, 1], [], []>} : vector<8x32xbf16>, vector<32x96xbf16>, vector<8x96xf32> -> vector<8x96xf32>
    %359 = vector.extract_strided_slice %356 {offsets = [0, 0], sizes = [8, 64], strides = [1, 1]} : vector<8x96xf32> to vector<8x64xf32>
    %360 = vector.extract_strided_slice %358 {offsets = [0, 0], sizes = [8, 64], strides = [1, 1]} : vector<8x96xf32> to vector<8x64xf32>
    %361 = arith.addf %359, %360 : vector<8x64xf32>
    %362 = arith.negf %361 : vector<8x64xf32>
    %363 = math.exp %362 : vector<8x64xf32>
    %cst_108 = arith.constant 1.000000e+00 : f32
    %364 = vector.broadcast %cst_108 : f32 to vector<8x64xf32>
    %365 = arith.addf %364, %363 : vector<8x64xf32>
    %366 = arith.divf %364, %365 : vector<8x64xf32>
    %367 = vector.extract_strided_slice %366 {offsets = [0, 0], sizes = [8, 32], strides = [1, 1]} : vector<8x64xf32> to vector<8x32xf32>
    %368 = vector.extract_strided_slice %366 {offsets = [0, 32], sizes = [8, 32], strides = [1, 1]} : vector<8x64xf32> to vector<8x32xf32>
    %369 = vector.extract_strided_slice %356 {offsets = [0, 64], sizes = [8, 32], strides = [1, 1]} : vector<8x96xf32> to vector<8x32xf32>
    %370 = vector.extract_strided_slice %358 {offsets = [0, 64], sizes = [8, 32], strides = [1, 1]} : vector<8x96xf32> to vector<8x32xf32>
    %371 = arith.addf %370, %274 : vector<8x32xf32>
    %372 = arith.mulf %367, %371 : vector<8x32xf32>
    %373 = arith.addf %369, %372 : vector<8x32xf32>
    %374 = math.tanh %373 : vector<8x32xf32>
    %cst_109 = arith.constant 1.000000e+00 : f32
    %375 = vector.broadcast %cst_109 : f32 to vector<8x32xf32>
    %376 = arith.subf %375, %368 : vector<8x32xf32>
    %377 = arith.mulf %376, %374 : vector<8x32xf32>
    %378 = arith.mulf %368, %353 : vector<8x32xf32>
    %379 = arith.addf %377, %378 : vector<8x32xf32>
    %c4_i32_110 = arith.constant 4 : i32
    %380 = arith.index_cast %c4_i32_110 : i32 to index
    %c0_111 = arith.constant 0 : index
    %c0_112 = arith.constant 0 : index
    %381 = vector.load %arg14[%380, %c0_111, %c0_112] : memref<8x8x96xf32, #tpu.memory_space<vmem>>, vector<1x8x96xf32>
    %382 = vector.shape_cast %381 : vector<1x8x96xf32> to vector<8x96xf32>
    %383 = arith.truncf %379 : vector<8x32xf32> to vector<8x32xbf16>
    %cst_113 = arith.constant dense<0.000000e+00> : vector<8x96xf32>
    %384 = tpu.matmul %383, %263, %cst_113 {dimension_numbers = #tpu.dot_dimension_numbers<[1], [0], [0], [1], [0, 0, 1, 1], [], []>} : vector<8x32xbf16>, vector<32x96xbf16>, vector<8x96xf32> -> vector<8x96xf32>
    %385 = vector.extract_strided_slice %382 {offsets = [0, 0], sizes = [8, 64], strides = [1, 1]} : vector<8x96xf32> to vector<8x64xf32>
    %386 = vector.extract_strided_slice %384 {offsets = [0, 0], sizes = [8, 64], strides = [1, 1]} : vector<8x96xf32> to vector<8x64xf32>
    %387 = arith.addf %385, %386 : vector<8x64xf32>
    %388 = arith.negf %387 : vector<8x64xf32>
    %389 = math.exp %388 : vector<8x64xf32>
    %cst_114 = arith.constant 1.000000e+00 : f32
    %390 = vector.broadcast %cst_114 : f32 to vector<8x64xf32>
    %391 = arith.addf %390, %389 : vector<8x64xf32>
    %392 = arith.divf %390, %391 : vector<8x64xf32>
    %393 = vector.extract_strided_slice %392 {offsets = [0, 0], sizes = [8, 32], strides = [1, 1]} : vector<8x64xf32> to vector<8x32xf32>
    %394 = vector.extract_strided_slice %392 {offsets = [0, 32], sizes = [8, 32], strides = [1, 1]} : vector<8x64xf32> to vector<8x32xf32>
    %395 = vector.extract_strided_slice %382 {offsets = [0, 64], sizes = [8, 32], strides = [1, 1]} : vector<8x96xf32> to vector<8x32xf32>
    %396 = vector.extract_strided_slice %384 {offsets = [0, 64], sizes = [8, 32], strides = [1, 1]} : vector<8x96xf32> to vector<8x32xf32>
    %397 = arith.addf %396, %274 : vector<8x32xf32>
    %398 = arith.mulf %393, %397 : vector<8x32xf32>
    %399 = arith.addf %395, %398 : vector<8x32xf32>
    %400 = math.tanh %399 : vector<8x32xf32>
    %cst_115 = arith.constant 1.000000e+00 : f32
    %401 = vector.broadcast %cst_115 : f32 to vector<8x32xf32>
    %402 = arith.subf %401, %394 : vector<8x32xf32>
    %403 = arith.mulf %402, %400 : vector<8x32xf32>
    %404 = arith.mulf %394, %379 : vector<8x32xf32>
    %405 = arith.addf %403, %404 : vector<8x32xf32>
    %c5_i32_116 = arith.constant 5 : i32
    %406 = arith.index_cast %c5_i32_116 : i32 to index
    %c0_117 = arith.constant 0 : index
    %c0_118 = arith.constant 0 : index
    %407 = vector.load %arg14[%406, %c0_117, %c0_118] : memref<8x8x96xf32, #tpu.memory_space<vmem>>, vector<1x8x96xf32>
    %408 = vector.shape_cast %407 : vector<1x8x96xf32> to vector<8x96xf32>
    %409 = arith.truncf %405 : vector<8x32xf32> to vector<8x32xbf16>
    %cst_119 = arith.constant dense<0.000000e+00> : vector<8x96xf32>
    %410 = tpu.matmul %409, %263, %cst_119 {dimension_numbers = #tpu.dot_dimension_numbers<[1], [0], [0], [1], [0, 0, 1, 1], [], []>} : vector<8x32xbf16>, vector<32x96xbf16>, vector<8x96xf32> -> vector<8x96xf32>
    %411 = vector.extract_strided_slice %408 {offsets = [0, 0], sizes = [8, 64], strides = [1, 1]} : vector<8x96xf32> to vector<8x64xf32>
    %412 = vector.extract_strided_slice %410 {offsets = [0, 0], sizes = [8, 64], strides = [1, 1]} : vector<8x96xf32> to vector<8x64xf32>
    %413 = arith.addf %411, %412 : vector<8x64xf32>
    %414 = arith.negf %413 : vector<8x64xf32>
    %415 = math.exp %414 : vector<8x64xf32>
    %cst_120 = arith.constant 1.000000e+00 : f32
    %416 = vector.broadcast %cst_120 : f32 to vector<8x64xf32>
    %417 = arith.addf %416, %415 : vector<8x64xf32>
    %418 = arith.divf %416, %417 : vector<8x64xf32>
    %419 = vector.extract_strided_slice %418 {offsets = [0, 0], sizes = [8, 32], strides = [1, 1]} : vector<8x64xf32> to vector<8x32xf32>
    %420 = vector.extract_strided_slice %418 {offsets = [0, 32], sizes = [8, 32], strides = [1, 1]} : vector<8x64xf32> to vector<8x32xf32>
    %421 = vector.extract_strided_slice %408 {offsets = [0, 64], sizes = [8, 32], strides = [1, 1]} : vector<8x96xf32> to vector<8x32xf32>
    %422 = vector.extract_strided_slice %410 {offsets = [0, 64], sizes = [8, 32], strides = [1, 1]} : vector<8x96xf32> to vector<8x32xf32>
    %423 = arith.addf %422, %274 : vector<8x32xf32>
    %424 = arith.mulf %419, %423 : vector<8x32xf32>
    %425 = arith.addf %421, %424 : vector<8x32xf32>
    %426 = math.tanh %425 : vector<8x32xf32>
    %cst_121 = arith.constant 1.000000e+00 : f32
    %427 = vector.broadcast %cst_121 : f32 to vector<8x32xf32>
    %428 = arith.subf %427, %420 : vector<8x32xf32>
    %429 = arith.mulf %428, %426 : vector<8x32xf32>
    %430 = arith.mulf %420, %405 : vector<8x32xf32>
    %431 = arith.addf %429, %430 : vector<8x32xf32>
    %c6_i32_122 = arith.constant 6 : i32
    %432 = arith.index_cast %c6_i32_122 : i32 to index
    %c0_123 = arith.constant 0 : index
    %c0_124 = arith.constant 0 : index
    %433 = vector.load %arg14[%432, %c0_123, %c0_124] : memref<8x8x96xf32, #tpu.memory_space<vmem>>, vector<1x8x96xf32>
    %434 = vector.shape_cast %433 : vector<1x8x96xf32> to vector<8x96xf32>
    %435 = arith.truncf %431 : vector<8x32xf32> to vector<8x32xbf16>
    %cst_125 = arith.constant dense<0.000000e+00> : vector<8x96xf32>
    %436 = tpu.matmul %435, %263, %cst_125 {dimension_numbers = #tpu.dot_dimension_numbers<[1], [0], [0], [1], [0, 0, 1, 1], [], []>} : vector<8x32xbf16>, vector<32x96xbf16>, vector<8x96xf32> -> vector<8x96xf32>
    %437 = vector.extract_strided_slice %434 {offsets = [0, 0], sizes = [8, 64], strides = [1, 1]} : vector<8x96xf32> to vector<8x64xf32>
    %438 = vector.extract_strided_slice %436 {offsets = [0, 0], sizes = [8, 64], strides = [1, 1]} : vector<8x96xf32> to vector<8x64xf32>
    %439 = arith.addf %437, %438 : vector<8x64xf32>
    %440 = arith.negf %439 : vector<8x64xf32>
    %441 = math.exp %440 : vector<8x64xf32>
    %cst_126 = arith.constant 1.000000e+00 : f32
    %442 = vector.broadcast %cst_126 : f32 to vector<8x64xf32>
    %443 = arith.addf %442, %441 : vector<8x64xf32>
    %444 = arith.divf %442, %443 : vector<8x64xf32>
    %445 = vector.extract_strided_slice %444 {offsets = [0, 0], sizes = [8, 32], strides = [1, 1]} : vector<8x64xf32> to vector<8x32xf32>
    %446 = vector.extract_strided_slice %444 {offsets = [0, 32], sizes = [8, 32], strides = [1, 1]} : vector<8x64xf32> to vector<8x32xf32>
    %447 = vector.extract_strided_slice %434 {offsets = [0, 64], sizes = [8, 32], strides = [1, 1]} : vector<8x96xf32> to vector<8x32xf32>
    %448 = vector.extract_strided_slice %436 {offsets = [0, 64], sizes = [8, 32], strides = [1, 1]} : vector<8x96xf32> to vector<8x32xf32>
    %449 = arith.addf %448, %274 : vector<8x32xf32>
    %450 = arith.mulf %445, %449 : vector<8x32xf32>
    %451 = arith.addf %447, %450 : vector<8x32xf32>
    %452 = math.tanh %451 : vector<8x32xf32>
    %cst_127 = arith.constant 1.000000e+00 : f32
    %453 = vector.broadcast %cst_127 : f32 to vector<8x32xf32>
    %454 = arith.subf %453, %446 : vector<8x32xf32>
    %455 = arith.mulf %454, %452 : vector<8x32xf32>
    %456 = arith.mulf %446, %431 : vector<8x32xf32>
    %457 = arith.addf %455, %456 : vector<8x32xf32>
    %c7_i32_128 = arith.constant 7 : i32
    %458 = arith.index_cast %c7_i32_128 : i32 to index
    %c0_129 = arith.constant 0 : index
    %c0_130 = arith.constant 0 : index
    %459 = vector.load %arg14[%458, %c0_129, %c0_130] : memref<8x8x96xf32, #tpu.memory_space<vmem>>, vector<1x8x96xf32>
    %460 = vector.shape_cast %459 : vector<1x8x96xf32> to vector<8x96xf32>
    %461 = arith.truncf %457 : vector<8x32xf32> to vector<8x32xbf16>
    %cst_131 = arith.constant dense<0.000000e+00> : vector<8x96xf32>
    %462 = tpu.matmul %461, %263, %cst_131 {dimension_numbers = #tpu.dot_dimension_numbers<[1], [0], [0], [1], [0, 0, 1, 1], [], []>} : vector<8x32xbf16>, vector<32x96xbf16>, vector<8x96xf32> -> vector<8x96xf32>
    %463 = vector.extract_strided_slice %460 {offsets = [0, 0], sizes = [8, 64], strides = [1, 1]} : vector<8x96xf32> to vector<8x64xf32>
    %464 = vector.extract_strided_slice %462 {offsets = [0, 0], sizes = [8, 64], strides = [1, 1]} : vector<8x96xf32> to vector<8x64xf32>
    %465 = arith.addf %463, %464 : vector<8x64xf32>
    %466 = arith.negf %465 : vector<8x64xf32>
    %467 = math.exp %466 : vector<8x64xf32>
    %cst_132 = arith.constant 1.000000e+00 : f32
    %468 = vector.broadcast %cst_132 : f32 to vector<8x64xf32>
    %469 = arith.addf %468, %467 : vector<8x64xf32>
    %470 = arith.divf %468, %469 : vector<8x64xf32>
    %471 = vector.extract_strided_slice %470 {offsets = [0, 0], sizes = [8, 32], strides = [1, 1]} : vector<8x64xf32> to vector<8x32xf32>
    %472 = vector.extract_strided_slice %470 {offsets = [0, 32], sizes = [8, 32], strides = [1, 1]} : vector<8x64xf32> to vector<8x32xf32>
    %473 = vector.extract_strided_slice %460 {offsets = [0, 64], sizes = [8, 32], strides = [1, 1]} : vector<8x96xf32> to vector<8x32xf32>
    %474 = vector.extract_strided_slice %462 {offsets = [0, 64], sizes = [8, 32], strides = [1, 1]} : vector<8x96xf32> to vector<8x32xf32>
    %475 = arith.addf %474, %274 : vector<8x32xf32>
    %476 = arith.mulf %471, %475 : vector<8x32xf32>
    %477 = arith.addf %473, %476 : vector<8x32xf32>
    %478 = math.tanh %477 : vector<8x32xf32>
    %cst_133 = arith.constant 1.000000e+00 : f32
    %479 = vector.broadcast %cst_133 : f32 to vector<8x32xf32>
    %480 = arith.subf %479, %472 : vector<8x32xf32>
    %481 = arith.mulf %480, %478 : vector<8x32xf32>
    %482 = arith.mulf %472, %457 : vector<8x32xf32>
    %483 = arith.addf %481, %482 : vector<8x32xf32>
    %c8_i32_134 = arith.constant 8 : i32
    %c0_135 = arith.constant 0 : index
    %c0_136 = arith.constant 0 : index
    %484 = vector.load %arg10[%c0_135, %c0_136] : memref<32x32xbf16, #tpu.memory_space<vmem>>, vector<32x32xbf16>
    %485 = arith.truncf %483 : vector<8x32xf32> to vector<8x32xbf16>
    %cst_137 = arith.constant dense<0.000000e+00> : vector<8x32xf32>
    %486 = tpu.matmul %485, %484, %cst_137 {dimension_numbers = #tpu.dot_dimension_numbers<[1], [0], [0], [1], [0, 0, 1, 1], [], []>} : vector<8x32xbf16>, vector<32x32xbf16>, vector<8x32xf32> -> vector<8x32xf32>
    %c0_138 = arith.constant 0 : index
    %c0_139 = arith.constant 0 : index
    %487 = vector.load %arg11[%c0_138, %c0_139] : memref<1x32xf32, #tpu.memory_space<vmem>>, vector<1x32xf32>
    %488 = vector.broadcast %487 : vector<1x32xf32> to vector<8x32xf32>
    %489 = arith.addf %486, %488 : vector<8x32xf32>
    %c0_140 = arith.constant 0 : index
    %c0_141 = arith.constant 0 : index
    %490 = vector.load %arg12[%c0_140, %c0_141] : memref<8x32xf32, #tpu.memory_space<vmem>>, vector<8x32xf32>
    tpu.vector_store %arg12[%c0_140, %c0_141], %489 {strides = array<i32>} : memref<8x32xf32, #tpu.memory_space<vmem>>, vector<8x32xf32>,
    return
  }
  func.func @transform_0(%arg0: i32) -> (i32, i32, i32) {
    %c0_i32 = arith.constant 0 : i32
    %c0_i32_0 = arith.constant 0 : i32
    %c0_i32_1 = arith.constant 0 : i32
    return %c0_i32, %arg0, %c0_i32_0 : i32, i32, i32
  }
  func.func @transform_1(%arg0: i32) -> (i32, i32) {
    %c0_i32 = arith.constant 0 : i32
    %c0_i32_0 = arith.constant 0 : i32
    %c0_i32_1 = arith.constant 0 : i32
    return %c0_i32, %c0_i32_0 : i32, i32
  }
  func.func @transform_2(%arg0: i32) -> (i32, i32) {
    %c0_i32 = arith.constant 0 : i32
    %c0_i32_0 = arith.constant 0 : i32
    %c0_i32_1 = arith.constant 0 : i32
    return %c0_i32, %c0_i32_0 : i32, i32
  }
  func.func @transform_3(%arg0: i32) -> (i32, i32) {
    %c0_i32 = arith.constant 0 : i32
    %c0_i32_0 = arith.constant 0 : i32
    %c0_i32_1 = arith.constant 0 : i32
    return %c0_i32, %c0_i32_0 : i32, i32
  }
  func.func @transform_4(%arg0: i32) -> (i32, i32) {
    %c0_i32 = arith.constant 0 : i32
    %c0_i32_0 = arith.constant 0 : i32
    %c0_i32_1 = arith.constant 0 : i32
    return %c0_i32, %c0_i32_0 : i32, i32
  }
  func.func @transform_5(%arg0: i32) -> (i32, i32) {
    %c0_i32 = arith.constant 0 : i32
    %c0_i32_0 = arith.constant 0 : i32
    %c0_i32_1 = arith.constant 0 : i32
    return %c0_i32, %c0_i32_0 : i32, i32
  }
  func.func @transform_6(%arg0: i32) -> (i32, i32) {
    %c0_i32 = arith.constant 0 : i32
    %c0_i32_0 = arith.constant 0 : i32
    %c0_i32_1 = arith.constant 0 : i32
    return %c0_i32, %c0_i32_0 : i32, i32
  }
  func.func @transform_7(%arg0: i32) -> (i32, i32) {
    %c0_i32 = arith.constant 0 : i32
    %c0_i32_0 = arith.constant 0 : i32
    %c0_i32_1 = arith.constant 0 : i32
    return %c0_i32, %c0_i32_0 : i32, i32
  }
  func.func @transform_8(%arg0: i32) -> (i32, i32) {
    %c0_i32 = arith.constant 0 : i32
    %c0_i32_0 = arith.constant 0 : i32
    %c0_i32_1 = arith.constant 0 : i32
    return %c0_i32, %c0_i32_0 : i32, i32
  }
  func.func @transform_9(%arg0: i32) -> (i32, i32) {
    %c0_i32 = arith.constant 0 : i32
    %c0_i32_0 = arith.constant 0 : i32
    %c0_i32_1 = arith.constant 0 : i32
    return %c0_i32, %c0_i32_0 : i32, i32
  }
  func.func @transform_10(%arg0: i32) -> (i32, i32) {
    %c0_i32 = arith.constant 0 : i32
    %c0_i32_0 = arith.constant 0 : i32
    %c0_i32_1 = arith.constant 0 : i32
    return %c0_i32, %c0_i32_0 : i32, i32
  }
  func.func @transform_11(%arg0: i32) -> (i32, i32) {
    %c0_i32 = arith.constant 0 : i32
    %c0_i32_0 = arith.constant 0 : i32
    return %arg0, %c0_i32 : i32, i32
  }
}

</mosaic_0001>

<bundles_post_ra>
// kernel: tpu_custom_call.1
= control target key start
LH: loop header
LB: loop body
LE: loop exit
PB: predicated region body
PF: predicated region fallthrough
CT: control target
= control target key end

     0   :  { %16 = vsyncpa [#allocation5], 0  ;;  %s2899_s0 = inlined_call_operand.hbm [shape: bf16[8,8,32], index: 0, kind: input, shape index: {}]   ;;  %s2900_s1 = inlined_call_operand.hbm [shape: bf16[32,96], index: 1, kind: input, shape index: {}]   ;;  %s2901_s2 = inlined_call_operand.hbm [shape: bf16[32,96], index: 2, kind: input, shape index: {}]   ;;  %s2902_s3 = inlined_call_operand.hbm [shape: f32[1,96], index: 3, kind: input, shape index: {}]   ;;  %s2903_s4 = inlined_call_operand.hbm [shape: f32[1,32], index: 4, kind: input, shape index: {}]   ;;  %s2904_s5 = inlined_call_operand.hbm [shape: bf16[32,96], index: 5, kind: input, shape index: {}]   ;;  %s2905_s6 = inlined_call_operand.hbm [shape: bf16[32,96], index: 6, kind: input, shape index: {}]   ;;  %s2906_s7 = inlined_call_operand.hbm [shape: f32[1,96], index: 7, kind: input, shape index: {}]   ;;  %s2907_s8 = inlined_call_operand.hbm [shape: f32[1,32], index: 8, kind: input, shape index: {}]   ;;  %s2908_s9 = inlined_call_operand.vmem [shape: bf16[32,32], index: 9, kind: input, shape index: {}]   ;;  %s2909_s10 = inlined_call_operand.vmem [shape: f32[1,32], index: 10, kind: input, shape index: {}]   ;;  %s2910_s11 = inlined_call_operand.hbm [shape: f32[8,32], index: 11, kind: output, shape index: {}]  }
   0x1   :  { %17 = vsyncpa [#allocation8], 0 }
   0x2   :  { %18 = vsyncpa [#allocation11], 0 }
   0x3   :  { %19 = vsyncpa [#allocation14], 0 }
   0x4   :  { %20 = vsyncpa [#allocation17], 0 }
   0x5   :  { %21 = vsyncpa [#allocation6], 0  ;;  %s2465_s17 = smov [#allocation7]   ;;  %s2466_s19 = smov [#allocation10]  }
   0x6   :  { %s39_s18 = sshll.u32 %s2465_s17, 4  ;;  %s64_s20 = sshll.u32 %s2466_s19, 4  ;;  %s40_s18 = int_to_ptr.vmem [resolvable:$true] %s39_s18  ;;  %s65_s20 = int_to_ptr.vmem [resolvable:$true] %s64_s20 }
   0x7   :  { %s2261_s21 = scalar_lea.vmem %s40_s18, 256  ;;  %p2266_p1 = scmp.lt.s32.totalorder %s40_s18, %s40_s18 }
   0x8   :  { %p2262_p0 = scmp.ne.s32.totalorder %s40_s18, %s2261_s21  ;;  %p2267_p2 = scmp.lt.s32.totalorder %s2261_s21, %s2261_s21 }
   0xa   :  { %p2268_p3 = por %p2267_p2, %p2266_p1 }
   0xc   :  { %p2269_p4 = pnand %p2268_p3, %p2262_p0 }
   0xe   :  { %2272 = shalt.err (!%p2269_p4)
}
   0xf   :  { %s2467_s22 = smov 64   ;;  %s2468_s23 = smov 4  }
  0x10   :  { %45 = dma.hbm_to_vmem [thread:$0]  %s2900_s1, 256, %s40_s18, [#allocation8], %s2467_s22, %s2467_s22, %s2468_s23  }
  0x11   :  { %s2281_s26 = scalar_lea.vmem %s65_s20, 16  ;;  %s2285_s27 = scalar_lea.vmem %s65_s20, 32 }
  0x12   :  { %p2282_p5 = scmp.ne.s32.totalorder %s65_s20, %s2281_s26  ;;  %p2286_p6 = scmp.lt.s32.totalorder %s65_s20, %s65_s20 }
  0x13   :  { %p2287_p7 = scmp.lt.s32.totalorder %s2285_s27, %s2281_s26 }
  0x15   :  { %p2288_p8 = por %p2287_p7, %p2286_p6 }
  0x17   :  { %p2289_p9 = pnand %p2288_p8, %p2282_p5 }
  0x19   :  { %2292 = shalt.err (!%p2289_p9)
}
  0x1a   :  { %67 = dma.hbm_to_vmem [thread:$0]  %s2902_s3, 16, %s65_s20, [#allocation11]  }
  0x1b   :  { %s2469_s30 = smov [#allocation13]   ;;  %s2470_s13 = smov [#allocation16]  }
  0x1c   :  { %s83_s12 = sshll.u32 %s2469_s30, 4  ;;  %s108_s14 = sshll.u32 %s2470_s13, 4  ;;  %s84_s12 = int_to_ptr.vmem [resolvable:$true] %s83_s12  ;;  %s109_s14 = int_to_ptr.vmem [resolvable:$true] %s108_s14 }
  0x1d   :  { %s2301_s15 = scalar_lea.vmem %s84_s12, 256  ;;  %p2306_p11 = scmp.lt.s32.totalorder %s84_s12, %s84_s12 }
  0x1e   :  { %p2302_p10 = scmp.ne.s32.totalorder %s84_s12, %s2301_s15  ;;  %p2307_p12 = scmp.lt.s32.totalorder %s2301_s15, %s2301_s15 }
  0x20   :  { %p2308_p13 = por %p2307_p12, %p2306_p11 }
  0x22   :  { %p2309_p0 = pnand %p2308_p13, %p2302_p10 }
  0x24   :  { %2312 = shalt.err (!%p2309_p0)
}
  0x25   :  { %89 = dma.hbm_to_vmem [thread:$0]  %s2904_s5, 256, %s84_s12, [#allocation14], %s2467_s22, %s2467_s22, %s2468_s23  }
  0x26   :  { %s2321_s3 = scalar_lea.vmem %s109_s14, 16  ;;  %s2325_s17 = scalar_lea.vmem %s109_s14, 32 }
  0x27   :  { %p2322_p1 = scmp.ne.s32.totalorder %s109_s14, %s2321_s3  ;;  %p2326_p2 = scmp.lt.s32.totalorder %s109_s14, %s109_s14 }
  0x28   :  { %p2327_p3 = scmp.lt.s32.totalorder %s2325_s17, %s2321_s3 }
  0x2a   :  { %p2328_p4 = por %p2327_p3, %p2326_p2 }
  0x2c   :  { %p2329_p5 = pnand %p2328_p4, %p2322_p1 }
  0x2e   :  { %2332 = shalt.err (!%p2329_p5)
}
  0x2f   :  { %111 = dma.hbm_to_vmem [thread:$0]  %s2906_s7, 16, %s109_s14, [#allocation17]  }
  0x30   :  { %s2471_s20 = smov [#allocation4]   ;;  %s2472_s24 = smov [#allocation9]  }
  0x31   :  { %s27_s21 = sshll.u32 %s2471_s20, 4  ;;  %s51_s25 = sshll.u32 %s2472_s24, 4  ;;  %s28_s21 = int_to_ptr.vmem [resolvable:$true] %s27_s21  ;;  %s52_s25 = int_to_ptr.vmem [resolvable:$true] %s51_s25 }
  0x32   :  { %s2341_s26 = scalar_lea.vmem %s28_s21, 512  ;;  %p2346_p7 = scmp.lt.s32.totalorder %s28_s21, %s28_s21 }
  0x33   :  { %p2342_p6 = scmp.ne.s32.totalorder %s28_s21, %s2341_s26  ;;  %p2347_p8 = scmp.lt.s32.totalorder %s2341_s26, %s2341_s26 }
  0x35   :  { %p2348_p9 = por %p2347_p8, %p2346_p7 }
  0x37   :  { %p2349_p10 = pnand %p2348_p9, %p2342_p6 }
  0x39   :  { %2352 = shalt.err (!%p2349_p10)
}
  0x3a   :  { %33 = dma.hbm_to_vmem [thread:$0]  %s2899_s0, 512, %s28_s21, [#allocation5], %s2467_s22, %s2467_s22, %s2468_s23  }
  0x3b   :  { %s2361_s7 = scalar_lea.vmem %s52_s25, 256  ;;  %p2366_p12 = scmp.lt.s32.totalorder %s52_s25, %s52_s25 }
  0x3c   :  { %p2362_p11 = scmp.ne.s32.totalorder %s52_s25, %s2361_s7  ;;  %p2367_p13 = scmp.lt.s32.totalorder %s2361_s7, %s2361_s7 }
  0x3e   :  { %p2368_p0 = por %p2367_p13, %p2366_p12 }
  0x40   :  { %p2369_p1 = pnand %p2368_p0, %p2362_p11 }
  0x42   :  { %2372 = shalt.err (!%p2369_p1)
}
  0x43   :  { %57 = dma.hbm_to_vmem [thread:$0]  %s2901_s2, 256, %s52_s25, [#allocation8], %s2467_s22, %s2467_s22, %s2468_s23  }
  0x44   :  { %s2473_s30 = smov [#allocation12]   ;;  %s2474_s13 = smov [#allocation15]  }
  0x45   :  { %s74_s12 = sshll.u32 %s2473_s30, 4  ;;  %s95_s14 = sshll.u32 %s2474_s13, 4  ;;  %s75_s12 = int_to_ptr.vmem [resolvable:$true] %s74_s12  ;;  %s96_s14 = int_to_ptr.vmem [resolvable:$true] %s95_s14 }
  0x46   :  { %s2381_s0 = scalar_lea.vmem %s75_s12, 16  ;;  %s2385_s15 = scalar_lea.vmem %s75_s12, 32 }
  0x47   :  { %p2382_p2 = scmp.ne.s32.totalorder %s75_s12, %s2381_s0  ;;  %p2386_p3 = scmp.lt.s32.totalorder %s75_s12, %s75_s12 }
  0x48   :  { %p2387_p4 = scmp.lt.s32.totalorder %s2385_s15, %s2381_s0 }
  0x4a   :  { %p2388_p5 = por %p2387_p4, %p2386_p3 }
  0x4c   :  { %p2389_p6 = pnand %p2388_p5, %p2382_p2 }
  0x4e   :  { %2392 = shalt.err (!%p2389_p6)
}
  0x4f   :  { %77 = dma.hbm_to_vmem [thread:$0]  %s2903_s4, 16, %s75_s12, [#allocation11]  }
  0x50   :  { %s2401_s3 = scalar_lea.vmem %s96_s14, 256  ;;  %p2406_p8 = scmp.lt.s32.totalorder %s96_s14, %s96_s14 }
  0x51   :  { %p2402_p7 = scmp.ne.s32.totalorder %s96_s14, %s2401_s3  ;;  %p2407_p9 = scmp.lt.s32.totalorder %s2401_s3, %s2401_s3 }
  0x53   :  { %p2408_p10 = por %p2407_p9, %p2406_p8 }
  0x55   :  { %p2409_p11 = pnand %p2408_p10, %p2402_p7 }
  0x57   :  { %2412 = shalt.err (!%p2409_p11)
}
  0x58   :  { %101 = dma.hbm_to_vmem [thread:$0]  %s2905_s6, 256, %s96_s14, [#allocation14], %s2467_s22, %s2467_s22, %s2468_s23  }
  0x59   :  { %s2475_s18 = smov [#allocation18]  }
  0x5a   :  { %s118_s19 = sshll.u32 %s2475_s18, 4  ;;  %s119_s19 = int_to_ptr.vmem [resolvable:$true] %s118_s19 }
  0x5b   :  { %s2421_s20 = scalar_lea.vmem %s119_s19, 16  ;;  %s2425_s4 = scalar_lea.vmem %s119_s19, 32 }
  0x5c   :  { %p2422_p12 = scmp.ne.s32.totalorder %s119_s19, %s2421_s20  ;;  %p2426_p13 = scmp.lt.s32.totalorder %s119_s19, %s119_s19 }
  0x5d   :  { %p2427_p0 = scmp.lt.s32.totalorder %s2425_s4, %s2421_s20 }
  0x5f   :  { %p2428_p1 = por %p2427_p0, %p2426_p13 }
  0x61   :  { %p2429_p2 = pnand %p2428_p1, %p2422_p12 }
  0x63   :  { %2432 = shalt.err (!%p2429_p2)
}
  0x64   :  { %121 = dma.hbm_to_vmem [thread:$0]  %s2907_s8, 16, %s119_s19, [#allocation17]  }
  0x65   :  { %2453 = dma.done.wait [#allocation5], 512  }
  0x66   :  { %2454 = vsyncadd [#allocation5], 4294966784 }
  0x67   :  { %2455 = dma.done.wait [#allocation8], 512  }
  0x68   :  { %2456 = vsyncadd [#allocation8], 4294966784 }
  0x69   :  { %2457 = dma.done.wait [#allocation11], 32  }
  0x6a   :  { %2458 = vsyncadd [#allocation11], 4294967264 }
  0x6b   :  { %2459 = dma.done.wait [#allocation14], 512  }
  0x6c   :  { %2460 = vsyncadd [#allocation14], 4294966784 }
  0x6d   :  { %2461 = dma.done.wait [#allocation17], 32  }
  0x6e   :  { %2462 = vsyncadd [#allocation17], 4294967264  ;;  %v2476_v0 = vmov 0.0   ;;  %vm2477_vm0 = vmmov 0   ;;  %v2139_v1 = vld [vmem:[#allocation7 + $0x8] sm:$0xff]   ;;  %v2586_v2 = vld [vmem:[#allocation9 + $0x8] sm:$0xff]  }
  0x6f   :  { %1975 = vmatprep.subr.bf16.mxu1 %v2476_v0  ;;  %1979 = vmatprep.mubr.msk.bf16.mxu1 %vm2477_vm0, %v2476_v0  ;;  %v2141_v3 = vld [vmem:[#allocation7] sm:$0xff]   ;;  %v2589_v4 = vld [vmem:[#allocation9] sm:$0xff]   ;;  %vm210_vm1 = vcmask 261120   ;;  %v2144_v6 = vld [vmem:[#allocation4 + $0x8] sm:$0xff]   ;;  %v2478_v8 = vmov 0   ;;  %vm288_vm2 = vcmask 785408  }
  0x70   :  { %1963 = vmatprep.subr.bf16.mxu0 %v2139_v1  ;;  %1976 = vmatpush3.bf16.msra.mxu1 %v2586_v2  ;;  %v2143_v5 = vld [vmem:[#allocation4] sm:$0xff]   ;;  %s2479_s6 = smov 96   ;;  %v2145_v57 = vld [vmem:[#allocation4 + $0x10] sm:$0xff]   ;;  %v2146_v58 = vld [vmem:[#allocation4 + $0x18] sm:$0xff]   ;;  %vm395_vm3 = vcmask 257024  }
  0x71   :  { %1964 = vmatpush3.bf16.msra.mxu0 %v2139_v1  ;;  %1977 = vmatprep.subr.bf16.mxu1 %v2476_v0  ;;  %v1833_v7 = vld [vmem:[#allocation12] ss:$0 sm:$0xff]  ;;  %v2611_v12 = vld [vmem:[#allocation10] ss:$0 sm:$0xff] }
  0x72   :  { %1965 = vmatprep.subr.bf16.mxu0 %v2141_v3  ;;  %1967 = vmatprep.mubr.msk.bf16.mxu0 %vm210_vm1, %v2143_v5 }
  0x73   :  { %365 = vrot.lane.b32.xlu0 %v1833_v7, %s2467_s22 }
  0x74   :  { %1978 = vmatpush3.bf16.msra.mxu1 %v2589_v4 }
  0x75   :  { %1966 = vmatpush3.bf16.msra.mxu0 %v2141_v3  ;;  %1983 = vmatprep.subr.bf16.mxu1 %v2476_v0 }
  0x76   :  { %1991 = vmatprep.subr.bf16.mxu0 %v2476_v0 }
  0x77   :  { %1980 = vmatmul.mubr.bf16.vlgmr.msra.gmra.mxu1 %v2478_v8 }
  0x78   :  { %1968 = vmatmul.mubr.msk.bf16.vlgmr.msra.gmra.mxu0 %vm210_vm1, %v2144_v6  ;;  %1984 = vmatpush3.bf16.msra.mxu1 %v2586_v2 }
  0x79   :  { %1987 = vmatprep.mubr.msk.bf16.mxu1 %vm2477_vm0, %v2476_v0  ;;  %1985 = vmatprep.subr.bf16.mxu1 %v2476_v0 }
  0x7a   :  { %1992 = vmatpush3.bf16.msra.mxu0 %v2586_v2  ;;  %1971 = vmatprep.mubr.msk.bf16.mxu0 %vm210_vm1, %v2145_v57 }
  0x7b   :  { %1993 = vmatprep.subr.bf16.mxu0 %v2476_v0 }
  0x7c   :  { %1986 = vmatpush3.bf16.msra.mxu1 %v2589_v4 }
  0x7d   :  { %1999 = vmatprep.subr.bf16.mxu1 %v2476_v0 }
  0x7e   :  { %1994 = vmatpush3.bf16.msra.mxu0 %v2589_v4 }
  0x7f   :  { %2007 = vmatprep.subr.bf16.mxu0 %v2476_v0 }
  0x80   :  { %1972 = vmatmul.mubr.msk.bf16.gmra.mxu0 %vm210_vm1, %v2146_v58 }
  0x81   :  { %1995 = vmatprep.mubr.msk.bf16.mxu0 %vm2477_vm0, %v2476_v0 }
  0xe5   :  { %v2609_v9 = vpop.permute.xlu0 %365 }
 0x137   :  { %v352_v10 = vpop.f32.mrf.mxu1 }
 0x138   :  { %v1969_v11 = vpop.f32.mrf.mxu0  ;;  %v368_v14 = vadd.f32 %v2609_v9, %v352_v10 }
 0x139   :  { %v266_v13 = vadd.f32 %v1969_v11, %v2611_v12  ;;  %v1981_v15 = vpop.f32.mrf.mxu1 }
 0x13a   :  { %v257_v16 = vpop.f32.mrf.mxu0  ;;  %370 = vrot.lane.b32.xlu0 %v368_v14, %s2467_s22 }
 0x13b   :  { %291 = vst.msk [vmem:[#allocation3 + $0x10] sm:$0xff] %vm288_vm2, %v266_v13  ;;  %v258_v17 = vadd.f32 %v2611_v12, %v257_v16  ;;  %v355_v18 = vpop.f32.mrf.mxu1 }
 0x13c   :  { %v1970_v19 = vpop.f32.mrf.mxu0 }
 0x13d   :  { %289 = vst.msk [vmem:[#allocation3] sm:$0xff] %vm288_vm2, %v258_v17  ;;  %v269_v20 = vadd.f32 %v1970_v19, %v2611_v12  ;;  %v1982_v21 = vpop.f32.mrf.mxu1 }
 0x13e   :  { %v260_v22 = vpop.f32.mrf.mxu0 }
 0x13f   :  { %292 = vst.msk [vmem:[#allocation3 + $0x18] sm:$0xff] %vm288_vm2, %v269_v20  ;;  %v261_v23 = vadd.f32 %v2611_v12, %v260_v22 }
 0x140   :  { %v1973_v5 = vpop.f32.mrf.mxu0 }
 0x141   :  { %290 = vst.msk [vmem:[#allocation3 + $0x8] sm:$0xff] %vm288_vm2, %v261_v23  ;;  %v282_v6 = vadd.f32 %v1973_v5, %v2611_v12 }
 0x142   :  { %v273_v7 = vpop.f32.mrf.mxu0  ;;  %v481_v21 = vld [vmem:[#allocation3 + $0x10] sm:$0xff] }
 0x143   :  { %295 = vst.msk [vmem:[#allocation3 + $0x30] sm:$0xff] %vm288_vm2, %v282_v6 }
 0x144   :  { %v302_v24 = vld [vmem:[#allocation3] sm:$0xff]  ;;  %v1974_v11 = vpop.f32.mrf.mxu0 }
 0x145   :  { %v358_v25 = vadd.f32 %v352_v10, %v302_v24  ;;  %v274_v10 = vadd.f32 %v2611_v12, %v273_v7  ;;  %v285_v13 = vadd.f32 %v1974_v11, %v2611_v12 }
 0x146   :  { %v276_v14 = vpop.f32.mrf.mxu0 }
 0x147   :  { %v1836_v26 = vmul.f32 -1.442695, %v358_v25  ;;  %293 = vst.msk [vmem:[#allocation3 + $0x20] sm:$0xff] %vm288_vm2, %v274_v10  ;;  %296 = vst.msk [vmem:[#allocation3 + $0x38] sm:$0xff] %vm288_vm2, %v285_v13  ;;  %v277_v15 = vadd.f32 %v2611_v12, %v276_v14 }
 0x148   :  { %v398_v47 = vld [vmem:[#allocation3 + $0x8] sm:$0xff] }
 0x149   :  { %2157 = vpow2.f32 %v1836_v26  ;;  %294 = vst.msk [vmem:[#allocation3 + $0x28] sm:$0xff] %vm288_vm2, %v277_v15 }
 0x14e   :  { %v647_v10 = vld [vmem:[#allocation3 + $0x20] sm:$0xff] }
 0x156   :  { %v2158_v27 = vpop.eup %2157 }
 0x157   :  { %v362_v28 = vadd.f32 1.0, %v2158_v27 }
 0x159   :  { %2159 = vrcp.f32 %v362_v28 }
 0x166   :  { %v2160_v29 = vpop.eup %2159 }
 0x167   :  { %v380_v35 = vsub.f32 1.0, %v2160_v29  ;;  %v386_v37 = vmul.f32 0.0, %v2160_v29 }
 0x1ac   :  { %v371_v30 = vpop.permute.xlu0 %370 }
 0x1ad   :  { %v373_v31 = vmul.f32 %v2160_v29, %v371_v30 }
 0x1af   :  { %375 = vrot.lane.b32.xlu1 %v373_v31, %s2467_s22 }
 0x221   :  { %v376_v32 = vpop.permute.xlu1 %375 }
 0x222   :  { %v378_v33 = vadd.f32 %v376_v32, %v302_v24 }
 0x224   :  { %2161 = vtanh.f32 %v378_v33 }
 0x231   :  { %v2162_v34 = vpop.eup %2161 }
 0x232   :  { %382 = vrot.lane.b32.xlu1 %v2162_v34, %s2479_s6 }
 0x2a4   :  { %v383_v36 = vpop.permute.xlu1 %382 }
 0x2a5   :  { %v385_v38 = vmul.f32 %v383_v36, %v380_v35 }
 0x2a7   :  { %v387_v39 = vadd.f32 %v386_v37, %v385_v38 }
 0x2a9   :  { %v2625_v40 = vpack.c.bf16 %v387_v39, %v387_v39 }
 0x2ab   :  { %399 = vrot.lane.b32.xlu0 %v2625_v40, %s2479_s6 }
 0x31d   :  { %v400_v41 = vpop.permute.xlu0 %399 }
 0x31e   :  { %1988 = vmatmul.mubr.msk.bf16.vlgmr.msra.gmra.mxu1 %vm210_vm1, %v400_v41 }
 0x31f   :  { %2000 = vmatpush3.bf16.msra.mxu1 %v2586_v2  ;;  %2003 = vmatprep.mubr.msk.bf16.mxu1 %vm2477_vm0, %v2476_v0 }
 0x320   :  { %2001 = vmatprep.subr.bf16.mxu1 %v2476_v0 }
 0x323   :  { %2002 = vmatpush3.bf16.msra.mxu1 %v2589_v4 }
 0x324   :  { %2015 = vmatprep.subr.bf16.mxu1 %v2476_v0 }
 0x3de   :  { %v438_v42 = vpop.f32.mrf.mxu1 }
 0x3df   :  { %v451_v43 = vadd.f32 %v438_v42, %v2609_v9  ;;  %v444_v48 = vadd.f32 %v438_v42, %v398_v47 }
 0x3e0   :  { %v1989_v44 = vpop.f32.mrf.mxu1 }
 0x3e1   :  { %453 = vrot.lane.b32.xlu1 %v451_v43, %s2467_s22  ;;  %v1839_v49 = vmul.f32 -1.442695, %v444_v48 }
 0x3e2   :  { %v441_v45 = vpop.f32.mrf.mxu1 }
 0x3e3   :  { %2163 = vpow2.f32 %v1839_v49  ;;  %v564_v45 = vld [vmem:[#allocation3 + $0x18] sm:$0xff] }
 0x3e4   :  { %v1990_v46 = vpop.f32.mrf.mxu1 }
 0x3f0   :  { %v2164_v50 = vpop.eup %2163 }
 0x3f1   :  { %v448_v51 = vadd.f32 1.0, %v2164_v50 }
 0x3f3   :  { %2165 = vrcp.f32 %v448_v51 }
 0x400   :  { %v2166_v52 = vpop.eup %2165 }
 0x401   :  { %v463_v60 = vsub.f32 1.0, %v2166_v52  ;;  %v469_v62 = vmul.f32 %v2166_v52, %v387_v39 }
 0x453   :  { %v454_v53 = vpop.permute.xlu1 %453 }
 0x454   :  { %v456_v54 = vmul.f32 %v2166_v52, %v454_v53 }
 0x456   :  { %458 = vrot.lane.b32.xlu0 %v456_v54, %s2467_s22 }
 0x4c8   :  { %v459_v55 = vpop.permute.xlu0 %458 }
 0x4c9   :  { %v461_v56 = vadd.f32 %v459_v55, %v398_v47 }
 0x4cb   :  { %2167 = vtanh.f32 %v461_v56 }
 0x4d8   :  { %v2168_v59 = vpop.eup %2167 }
 0x4d9   :  { %465 = vrot.lane.b32.xlu1 %v2168_v59, %s2479_s6 }
 0x54b   :  { %v466_v61 = vpop.permute.xlu1 %465 }
 0x54c   :  { %v468_v63 = vmul.f32 %v466_v61, %v463_v60 }
 0x54e   :  { %v470_v1 = vadd.f32 %v469_v62, %v468_v63 }
 0x550   :  { %v2644_v3 = vpack.c.bf16 %v470_v1, %v470_v1 }
 0x552   :  { %482 = vrot.lane.b32.xlu0 %v2644_v3, %s2479_s6 }
 0x5c4   :  { %v483_v16 = vpop.permute.xlu0 %482 }
 0x5c5   :  { %1996 = vmatmul.mubr.msk.bf16.vlgmr.msra.gmra.mxu0 %vm210_vm1, %v483_v16 }
 0x5c6   :  { %2008 = vmatpush3.bf16.msra.mxu0 %v2586_v2  ;;  %2011 = vmatprep.mubr.msk.bf16.mxu0 %vm2477_vm0, %v2476_v0 }
 0x5c7   :  { %2009 = vmatprep.subr.bf16.mxu0 %v2476_v0 }
 0x5ca   :  { %2010 = vmatpush3.bf16.msra.mxu0 %v2589_v4 }
 0x5cb   :  { %2023 = vmatprep.subr.bf16.mxu0 %v2476_v0 }
 0x685   :  { %v521_v17 = vpop.f32.mrf.mxu0 }
 0x686   :  { %v534_v18 = vadd.f32 %v521_v17, %v2609_v9  ;;  %v527_v22 = vadd.f32 %v521_v17, %v481_v21 }
 0x687   :  { %v1997_v12 = vpop.f32.mrf.mxu0 }
 0x688   :  { %536 = vrot.lane.b32.xlu1 %v534_v18, %s2467_s22  ;;  %v1842_v23 = vmul.f32 -1.442695, %v527_v22 }
 0x689   :  { %v524_v19 = vpop.f32.mrf.mxu0 }
 0x68a   :  { %2169 = vpow2.f32 %v1842_v23 }
 0x68b   :  { %v1998_v20 = vpop.f32.mrf.mxu0 }
 0x697   :  { %v2170_v24 = vpop.eup %2169 }
 0x698   :  { %v531_v25 = vadd.f32 1.0, %v2170_v24 }
 0x69a   :  { %2171 = vrcp.f32 %v531_v25 }
 0x6a7   :  { %v2172_v26 = vpop.eup %2171 }
 0x6a8   :  { %v546_v32 = vsub.f32 1.0, %v2172_v26  ;;  %v552_v34 = vmul.f32 %v2172_v26, %v470_v1 }
 0x6fa   :  { %v537_v27 = vpop.permute.xlu1 %536 }
 0x6fb   :  { %v539_v28 = vmul.f32 %v2172_v26, %v537_v27 }
 0x6fd   :  { %541 = vrot.lane.b32.xlu0 %v539_v28, %s2467_s22 }
 0x76f   :  { %v542_v29 = vpop.permute.xlu0 %541 }
 0x770   :  { %v544_v30 = vadd.f32 %v542_v29, %v481_v21 }
 0x772   :  { %2173 = vtanh.f32 %v544_v30 }
 0x77f   :  { %v2174_v31 = vpop.eup %2173 }
 0x780   :  { %548 = vrot.lane.b32.xlu1 %v2174_v31, %s2479_s6 }
 0x7f2   :  { %v549_v33 = vpop.permute.xlu1 %548 }
 0x7f3   :  { %v551_v35 = vmul.f32 %v549_v33, %v546_v32  ;;  %v730_v33 = vld [vmem:[#allocation3 + $0x28] sm:$0xff] }
 0x7f5   :  { %v553_v36 = vadd.f32 %v552_v34, %v551_v35 }
 0x7f7   :  { %v2667_v37 = vpack.c.bf16 %v553_v36, %v553_v36 }
 0x7f9   :  { %565 = vrot.lane.b32.xlu0 %v2667_v37, %s2479_s6 }
 0x86b   :  { %v566_v38 = vpop.permute.xlu0 %565 }
 0x86c   :  { %2004 = vmatmul.mubr.msk.bf16.vlgmr.msra.gmra.mxu1 %vm210_vm1, %v566_v38 }
 0x86d   :  { %2016 = vmatpush3.bf16.msra.mxu1 %v2586_v2  ;;  %2019 = vmatprep.mubr.msk.bf16.mxu1 %vm2477_vm0, %v2476_v0 }
 0x86e   :  { %2017 = vmatprep.subr.bf16.mxu1 %v2476_v0 }
 0x871   :  { %2018 = vmatpush3.bf16.msra.mxu1 %v2589_v4 }
 0x872   :  { %2031 = vmatprep.subr.bf16.mxu1 %v2476_v0 }
 0x92c   :  { %v604_v39 = vpop.f32.mrf.mxu1 }
 0x92d   :  { %v617_v41 = vadd.f32 %v604_v39, %v2609_v9  ;;  %v610_v46 = vadd.f32 %v604_v39, %v564_v45 }
 0x92e   :  { %v2005_v42 = vpop.f32.mrf.mxu1 }
 0x92f   :  { %619 = vrot.lane.b32.xlu1 %v617_v41, %s2467_s22  ;;  %v1845_v47 = vmul.f32 -1.442695, %v610_v46 }
 0x930   :  { %v607_v43 = vpop.f32.mrf.mxu1 }
 0x931   :  { %2175 = vpow2.f32 %v1845_v47 }
 0x932   :  { %v2006_v44 = vpop.f32.mrf.mxu1 }
 0x93e   :  { %v2176_v48 = vpop.eup %2175 }
 0x93f   :  { %v614_v49 = vadd.f32 1.0, %v2176_v48 }
 0x941   :  { %2177 = vrcp.f32 %v614_v49 }
 0x94e   :  { %v2178_v50 = vpop.eup %2177 }
 0x94f   :  { %v629_v56 = vsub.f32 1.0, %v2178_v50  ;;  %v635_v58 = vmul.f32 %v2178_v50, %v553_v36 }
 0x9a1   :  { %v620_v51 = vpop.permute.xlu1 %619 }
 0x9a2   :  { %v622_v52 = vmul.f32 %v2178_v50, %v620_v51 }
 0x9a4   :  { %624 = vrot.lane.b32.xlu0 %v622_v52, %s2467_s22 }
 0xa16   :  { %v625_v53 = vpop.permute.xlu0 %624 }
 0xa17   :  { %v627_v54 = vadd.f32 %v625_v53, %v564_v45 }
 0xa19   :  { %2179 = vtanh.f32 %v627_v54 }
 0xa26   :  { %v2180_v55 = vpop.eup %2179 }
 0xa27   :  { %631 = vrot.lane.b32.xlu1 %v2180_v55, %s2479_s6 }
 0xa99   :  { %v632_v57 = vpop.permute.xlu1 %631 }
 0xa9a   :  { %v634_v59 = vmul.f32 %v632_v57, %v629_v56  ;;  %v813_v56 = vld [vmem:[#allocation3 + $0x30] sm:$0xff] }
 0xa9c   :  { %v636_v60 = vadd.f32 %v635_v58, %v634_v59 }
 0xa9e   :  { %v2682_v61 = vpack.c.bf16 %v636_v60, %v636_v60 }
 0xaa0   :  { %648 = vrot.lane.b32.xlu0 %v2682_v61, %s2479_s6 }
 0xb12   :  { %v649_v62 = vpop.permute.xlu0 %648 }
 0xb13   :  { %2012 = vmatmul.mubr.msk.bf16.vlgmr.msra.gmra.mxu0 %vm210_vm1, %v649_v62 }
 0xb14   :  { %2024 = vmatpush3.bf16.msra.mxu0 %v2586_v2  ;;  %2027 = vmatprep.mubr.msk.bf16.mxu0 %vm2477_vm0, %v2476_v0 }
 0xb15   :  { %2025 = vmatprep.subr.bf16.mxu0 %v2476_v0 }
 0xb18   :  { %2026 = vmatpush3.bf16.msra.mxu0 %v2589_v4 }
 0xbd3   :  { %v687_v63 = vpop.f32.mrf.mxu0 }
 0xbd4   :  { %v700_v1 = vadd.f32 %v687_v63, %v2609_v9  ;;  %v693_v11 = vadd.f32 %v687_v63, %v647_v10 }
 0xbd5   :  { %v2013_v5 = vpop.f32.mrf.mxu0 }
 0xbd6   :  { %702 = vrot.lane.b32.xlu1 %v700_v1, %s2467_s22  ;;  %v1848_v13 = vmul.f32 -1.442695, %v693_v11 }
 0xbd7   :  { %v690_v6 = vpop.f32.mrf.mxu0 }
 0xbd8   :  { %2181 = vpow2.f32 %v1848_v13 }
 0xbd9   :  { %v2014_v7 = vpop.f32.mrf.mxu0 }
 0xbe5   :  { %v2182_v14 = vpop.eup %2181 }
 0xbe6   :  { %v697_v15 = vadd.f32 1.0, %v2182_v14 }
 0xbe8   :  { %2183 = vrcp.f32 %v697_v15  ;;  %v2149_v15 = vld [vmem:[#allocation13 + $0x8] sm:$0xff]  }
 0xbe9   :  { %2039 = vmatprep.subr.bf16.mxu0 %v2149_v15 }
 0xbf5   :  { %v2184_v16 = vpop.eup %2183 }
 0xbf6   :  { %v712_v21 = vsub.f32 1.0, %v2184_v16  ;;  %v718_v23 = vmul.f32 %v2184_v16, %v636_v60 }
 0xc48   :  { %v703_v17 = vpop.permute.xlu1 %702 }
 0xc49   :  { %v705_v18 = vmul.f32 %v2184_v16, %v703_v17  ;;  %v2150_v16 = vld [vmem:[#allocation13] sm:$0xff]  }
 0xc4b   :  { %707 = vrot.lane.b32.xlu0 %v705_v18, %s2467_s22 }
 0xcbd   :  { %v708_v12 = vpop.permute.xlu0 %707 }
 0xcbe   :  { %v710_v19 = vadd.f32 %v708_v12, %v647_v10  ;;  %v1870_v12 = vld [vmem:[#allocation18] ss:$0 sm:$0xff] }
 0xcc0   :  { %2185 = vtanh.f32 %v710_v19  ;;  %v2740_v19 = vld [vmem:[#allocation15 + $0x8] sm:$0xff]  }
 0xccd   :  { %v2186_v20 = vpop.eup %2185 }
 0xcce   :  { %714 = vrot.lane.b32.xlu1 %v2186_v20, %s2479_s6 }
 0xd40   :  { %v715_v22 = vpop.permute.xlu1 %714 }
 0xd41   :  { %v717_v24 = vmul.f32 %v715_v22, %v712_v21  ;;  %v2744_v21 = vld [vmem:[#allocation15] sm:$0xff]  }
 0xd43   :  { %v719_v25 = vadd.f32 %v718_v23, %v717_v24 }
 0xd45   :  { %v2696_v26 = vpack.c.bf16 %v719_v25, %v719_v25 }
 0xd47   :  { %731 = vrot.lane.b32.xlu0 %v2696_v26, %s2479_s6 }
 0xdb9   :  { %v732_v27 = vpop.permute.xlu0 %731 }
 0xdba   :  { %2020 = vmatmul.mubr.msk.bf16.vlgmr.msra.gmra.mxu1 %vm210_vm1, %v732_v27 }
 0xdbb   :  { %2032 = vmatpush3.bf16.msra.mxu1 %v2586_v2  ;;  %2035 = vmatprep.mubr.msk.bf16.mxu1 %vm2477_vm0, %v2476_v0 }
 0xdbc   :  { %2033 = vmatprep.subr.bf16.mxu1 %v2476_v0 }
 0xdbf   :  { %2034 = vmatpush3.bf16.msra.mxu1 %v2589_v4 }
 0xdc0   :  { %2051 = vmatprep.subr.bf16.mxu1 %v2476_v0 }
 0xe7a   :  { %v770_v28 = vpop.f32.mrf.mxu1 }
 0xe7b   :  { %v783_v29 = vadd.f32 %v770_v28, %v2609_v9  ;;  %v776_v34 = vadd.f32 %v770_v28, %v730_v33 }
 0xe7c   :  { %v2021_v30 = vpop.f32.mrf.mxu1 }
 0xe7d   :  { %785 = vrot.lane.b32.xlu1 %v783_v29, %s2467_s22  ;;  %v1851_v2 = vmul.f32 -1.442695, %v776_v34  ;;  %v2770_v34 = vld [vmem:[#allocation16] ss:$0 sm:$0xff] }
 0xe7e   :  { %v773_v31 = vpop.f32.mrf.mxu1 }
 0xe7f   :  { %2187 = vpow2.f32 %v1851_v2 }
 0xe80   :  { %v2022_v32 = vpop.f32.mrf.mxu1 }
 0xe8c   :  { %v2188_v35 = vpop.eup %2187 }
 0xe8d   :  { %v780_v36 = vadd.f32 1.0, %v2188_v35 }
 0xe8f   :  { %2189 = vrcp.f32 %v780_v36 }
 0xe9c   :  { %v2190_v38 = vpop.eup %2189 }
 0xe9d   :  { %v795_v44 = vsub.f32 1.0, %v2190_v38  ;;  %v801_v46 = vmul.f32 %v2190_v38, %v719_v25 }
 0xeef   :  { %v786_v39 = vpop.permute.xlu1 %785 }
 0xef0   :  { %v788_v4 = vmul.f32 %v2190_v38, %v786_v39 }
 0xef2   :  { %790 = vrot.lane.b32.xlu0 %v788_v4, %s2467_s22 }
 0xf64   :  { %v791_v41 = vpop.permute.xlu0 %790 }
 0xf65   :  { %v793_v42 = vadd.f32 %v791_v41, %v730_v33 }
 0xf67   :  { %2191 = vtanh.f32 %v793_v42 }
 0xf74   :  { %v2192_v43 = vpop.eup %2191 }
 0xf75   :  { %797 = vrot.lane.b32.xlu1 %v2192_v43, %s2479_s6 }
 0xfe7   :  { %v798_v45 = vpop.permute.xlu1 %797 }
 0xfe8   :  { %v800_v47 = vmul.f32 %v798_v45, %v795_v44 }
 0xfea   :  { %v802_v48 = vadd.f32 %v801_v46, %v800_v47 }
 0xfec   :  { %v2711_v49 = vpack.c.bf16 %v802_v48, %v802_v48 }
 0xfee   :  { %814 = vrot.lane.b32.xlu0 %v2711_v49, %s2479_s6 }
0x1060   :  { %v815_v50 = vpop.permute.xlu0 %814 }
0x1061   :  { %2028 = vmatmul.mubr.msk.bf16.vlgmr.msra.gmra.mxu0 %vm210_vm1, %v815_v50 }
0x1062   :  { %2040 = vmatpush3.bf16.msra.mxu0 %v2149_v15 }
0x1063   :  { %2041 = vmatprep.subr.bf16.mxu0 %v2150_v16 }
0x1066   :  { %2042 = vmatpush3.bf16.msra.mxu0 %v2150_v16 }
0x1067   :  { %2067 = vmatprep.subr.bf16.mxu0 %v2476_v0 }
0x1121   :  { %v853_v51 = vpop.f32.mrf.mxu0 }
0x1122   :  { %v866_v52 = vadd.f32 %v853_v51, %v2609_v9  ;;  %v859_v57 = vadd.f32 %v853_v51, %v813_v56 }
0x1123   :  { %v2029_v53 = vpop.f32.mrf.mxu0 }
0x1124   :  { %868 = vrot.lane.b32.xlu1 %v866_v52, %s2467_s22  ;;  %v1854_v58 = vmul.f32 -1.442695, %v859_v57 }
0x1125   :  { %v856_v54 = vpop.f32.mrf.mxu0 }
0x1126   :  { %2193 = vpow2.f32 %v1854_v58 }
0x1127   :  { %v2030_v55 = vpop.f32.mrf.mxu0 }
0x1133   :  { %v2194_v59 = vpop.eup %2193 }
0x1134   :  { %v863_v60 = vadd.f32 1.0, %v2194_v59 }
0x1136   :  { %2195 = vrcp.f32 %v863_v60 }
0x1143   :  { %v2196_v62 = vpop.eup %2195 }
0x1144   :  { %v878_v10 = vsub.f32 1.0, %v2196_v62  ;;  %v884_v13 = vmul.f32 %v2196_v62, %v802_v48 }
0x1196   :  { %v869_v63 = vpop.permute.xlu1 %868 }
0x1197   :  { %v871_v1 = vmul.f32 %v2196_v62, %v869_v63 }
0x1199   :  { %873 = vrot.lane.b32.xlu0 %v871_v1, %s2467_s22 }
0x120b   :  { %v874_v5 = vpop.permute.xlu0 %873 }
0x120c   :  { %v876_v6 = vadd.f32 %v874_v5, %v813_v56  ;;  %v896_v56 = vld [vmem:[#allocation3 + $0x38] sm:$0xff] }
0x120e   :  { %2197 = vtanh.f32 %v876_v6 }
0x121b   :  { %v2198_v7 = vpop.eup %2197 }
0x121c   :  { %880 = vrot.lane.b32.xlu1 %v2198_v7, %s2479_s6 }
0x1220   :  { %392 = vrot.lane.b32.xlu1 %v2625_v40, %s2479_s6 }
0x1224   :  { %558 = vrot.lane.b32.xlu1 %v2667_v37, %s2479_s6 }
0x1228   :  { %1184 = vrot.lane.b32.xlu1 %v1870_v12, %s2467_s22 }
0x128e   :  { %v881_v11 = vpop.permute.xlu1 %880 }
0x128f   :  { %v883_v14 = vmul.f32 %v881_v11, %v878_v10 }
0x1291   :  { %v2724_v17 = vadd.f32 %v884_v13, %v883_v14 }
0x1292   :  { %v393_v18 = vpop.permute.xlu1 %392 }
0x1293   :  { %396 = vst.msk [vmem:[#allocation2] sm:$0xf] %vm395_vm3, %v393_v18  ;;  %v2729_v40 = vpack.c.bf16 %v2724_v17, %v2724_v17 }
0x1295   :  { %897 = vrot.lane.b32.xlu0 %v2729_v40, %s2479_s6 }
0x1296   :  { %v559_v37 = vpop.permute.xlu1 %558 }
0x1297   :  { %562 = vst.msk [vmem:[#allocation2 + $0x8] sm:$0xf] %vm395_vm3, %v559_v37 }
0x1299   :  { %475 = vrot.lane.b32.xlu0 %v2644_v3, %s2479_s6 }
0x129a   :  { %v2766_v28 = vpop.permute.xlu1 %1184 }
0x129d   :  { %641 = vrot.lane.b32.xlu0 %v2682_v61, %s2479_s6 }
0x1307   :  { %v898_v20 = vpop.permute.xlu0 %897 }
0x1308   :  { %2036 = vmatmul.mubr.msk.bf16.vlgmr.msra.gmra.mxu1 %vm210_vm1, %v898_v20 }
0x1309   :  { %2052 = vmatpush3.bf16.msra.mxu1 %v2740_v19  ;;  %2055 = vmatprep.mubr.msk.bf16.mxu1 %vm2477_vm0, %v2476_v0 }
0x130a   :  { %2053 = vmatprep.subr.bf16.mxu1 %v2476_v0 }
0x130b   :  { %v476_v3 = vpop.permute.xlu0 %475 }
0x130c   :  { %479 = vst.msk [vmem:[#allocation2 + $0x4] sm:$0xf] %vm395_vm3, %v476_v3 }
0x130d   :  { %2054 = vmatpush3.bf16.msra.mxu1 %v2744_v21 }
0x130e   :  { %2059 = vmatprep.subr.bf16.mxu1 %v2476_v0 }
0x130f   :  { %v642_v61 = vpop.permute.xlu0 %641 }
0x1310   :  { %645 = vst.msk [vmem:[#allocation2 + $0xc] sm:$0xf] %vm395_vm3, %v642_v61  ;;  %2056 = vmatmul.mubr.bf16.vlgmr.msra.gmra.mxu1 %v2478_v8 }
0x1311   :  { %2060 = vmatpush3.bf16.msra.mxu1 %v2740_v19  ;;  %2063 = vmatprep.mubr.msk.bf16.mxu1 %vm2477_vm0, %v2476_v0 }
0x1312   :  { %2061 = vmatprep.subr.bf16.mxu1 %v2476_v0 }
0x1313   :  { %v2151_v22 = vld [vmem:[#allocation2] sm:$0xff]  }
0x1314   :  { %2043 = vmatprep.mubr.msk.bf16.mxu0 %vm210_vm1, %v2151_v22 }
0x1315   :  { %2062 = vmatpush3.bf16.msra.mxu1 %v2744_v21 }
0x1316   :  { %2075 = vmatprep.subr.bf16.mxu1 %v2476_v0 }
0x1317   :  { %v2152_v23 = vld [vmem:[#allocation2 + $0x8] sm:$0xff]  }
0x1318   :  { %2044 = vmatmul.mubr.msk.bf16.vlgmr.msra.gmra.mxu0 %vm210_vm1, %v2152_v23 }
0x1319   :  { %2068 = vmatpush3.bf16.msra.mxu0 %v2740_v19 }
0x131a   :  { %2069 = vmatprep.subr.bf16.mxu0 %v2476_v0 }
0x131d   :  { %2070 = vmatpush3.bf16.msra.mxu0 %v2744_v21 }
0x131e   :  { %2083 = vmatprep.subr.bf16.mxu0 %v2476_v0 }
0x13c8   :  { %v936_v8 = vpop.f32.mrf.mxu1 }
0x13c9   :  { %v949_v55 = vadd.f32 %v936_v8, %v2609_v9  ;;  %v942_v57 = vadd.f32 %v936_v8, %v896_v56 }
0x13ca   :  { %v2037_v24 = vpop.f32.mrf.mxu1 }
0x13cb   :  { %v1857_v58 = vmul.f32 -1.442695, %v942_v57 }
0x13cc   :  { %v939_v25 = vpop.f32.mrf.mxu1 }
0x13ce   :  { %v2038_v27 = vpop.f32.mrf.mxu1 }
0x13d0   :  { %v1171_v29 = vpop.f32.mrf.mxu1 }
0x13d1   :  { %v1187_v30 = vadd.f32 %v2766_v28, %v1171_v29 }
0x13d2   :  { %v2057_v31 = vpop.f32.mrf.mxu1 }
0x13d3   :  { %1189 = vrot.lane.b32.xlu0 %v1187_v30, %s2467_s22 }
0x13d4   :  { %v1174_v32 = vpop.f32.mrf.mxu1 }
0x13d6   :  { %v2058_v33 = vpop.f32.mrf.mxu1 }
0x13d8   :  { %v2045_v2 = vpop.f32.mrf.mxu0 }
0x13d9   :  { %v1089_v35 = vadd.f32 %v2045_v2, %v2770_v34 }
0x13da   :  { %v1080_v36 = vpop.f32.mrf.mxu0 }
0x13db   :  { %1113 = vst.msk [vmem:[#allocation3 + $0x10] sm:$0xff] %vm288_vm2, %v1089_v35  ;;  %v1081_v38 = vadd.f32 %v2770_v34, %v1080_v36 }
0x13dc   :  { %v2046_v39 = vpop.f32.mrf.mxu0 }
0x13dd   :  { %1111 = vst.msk [vmem:[#allocation3] sm:$0xff] %vm288_vm2, %v1081_v38  ;;  %v1092_v4 = vadd.f32 %v2046_v39, %v2770_v34 }
0x13de   :  { %v1083_v41 = vpop.f32.mrf.mxu0 }
0x13df   :  { %1114 = vst.msk [vmem:[#allocation3 + $0x18] sm:$0xff] %vm288_vm2, %v1092_v4  ;;  %v1084_v42 = vadd.f32 %v2770_v34, %v1083_v41 }
0x13e1   :  { %1112 = vst.msk [vmem:[#allocation3 + $0x8] sm:$0xff] %vm288_vm2, %v1084_v42 }
0x13e4   :  { %v1124_v43 = vld [vmem:[#allocation3] sm:$0xff] }
0x13e5   :  { %v1177_v44 = vadd.f32 %v1171_v29, %v1124_v43 }
0x13e7   :  { %v1873_v45 = vmul.f32 -1.442695, %v1177_v44 }
0x13e8   :  { %v1207_v8 = vld [vmem:[#allocation3 + $0x8] sm:$0xff] }
0x13e9   :  { %2199 = vpow2.f32 %v1873_v45 }
0x13f6   :  { %v2200_v46 = vpop.eup %2199 }
0x13f7   :  { %v1181_v47 = vadd.f32 1.0, %v2200_v46 }
0x13f9   :  { %2201 = vrcp.f32 %v1181_v47 }
0x1406   :  { %v2202_v48 = vpop.eup %2201 }
0x1407   :  { %v1199_v62 = vsub.f32 1.0, %v2202_v48  ;;  %v1205_v1 = vmul.f32 0.0, %v2202_v48 }
0x1445   :  { %v1190_v50 = vpop.permute.xlu0 %1189 }
0x1446   :  { %v1192_v51 = vmul.f32 %v2202_v48, %v1190_v50 }
0x1448   :  { %1194 = vrot.lane.b32.xlu1 %v1192_v51, %s2467_s22 }
0x14ba   :  { %v1195_v52 = vpop.permute.xlu1 %1194 }
0x14bb   :  { %v1197_v53 = vadd.f32 %v1195_v52, %v1124_v43 }
0x14bd   :  { %2203 = vtanh.f32 %v1197_v53 }
0x14be   :  { %2205 = vpow2.f32 %v1857_v58 }
0x14ca   :  { %v2204_v54 = vpop.eup %2203 }
0x14cb   :  { %1201 = vrot.lane.b32.xlu0 %v2204_v54, %s2479_s6  ;;  %v2206_v59 = vpop.eup %2205 }
0x14cc   :  { %v946_v60 = vadd.f32 1.0, %v2206_v59 }
0x14ce   :  { %2207 = vrcp.f32 %v946_v60 }
0x14cf   :  { %951 = vrot.lane.b32.xlu0 %v949_v55, %s2467_s22 }
0x14db   :  { %v2208_v7 = vpop.eup %2207 }
0x14dc   :  { %v961_v33 = vsub.f32 1.0, %v2208_v7  ;;  %v967_v36 = vmul.f32 %v2208_v7, %v2724_v17 }
0x153d   :  { %v1202_v63 = vpop.permute.xlu0 %1201 }
0x153e   :  { %v1204_v5 = vmul.f32 %v1202_v63, %v1199_v62 }
0x1540   :  { %v1206_v6 = vadd.f32 %v1205_v1, %v1204_v5  ;;  %v1282_v1 = vld [vmem:[#allocation3 + $0x10] sm:$0xff] }
0x1541   :  { %v952_v10 = vpop.permute.xlu0 %951 }
0x1542   :  { %v954_v11 = vmul.f32 %v2208_v7, %v952_v10  ;;  %v1208_v13 = vpack.c.bf16 %v1206_v6, %v1206_v6 }
0x1544   :  { %1210 = vrot.lane.b32.xlu1 %v1208_v13, %s2479_s6  ;;  %956 = vrot.lane.b32.xlu0 %v954_v11, %s2467_s22 }
0x15b6   :  { %v1211_v9 = vpop.permute.xlu1 %1210  ;;  %v957_v14 = vpop.permute.xlu0 %956 }
0x15b7   :  { %v959_v15 = vadd.f32 %v957_v14, %v896_v56  ;;  %2064 = vmatmul.mubr.msk.bf16.vlgmr.msra.gmra.mxu1 %vm210_vm1, %v1211_v9 }
0x15b8   :  { %2076 = vmatpush3.bf16.msra.mxu1 %v2740_v19  ;;  %2079 = vmatprep.mubr.msk.bf16.mxu1 %vm2477_vm0, %v2476_v0 }
0x15b9   :  { %2209 = vtanh.f32 %v959_v15  ;;  %2077 = vmatprep.subr.bf16.mxu1 %v2476_v0 }
0x15bc   :  { %2078 = vmatpush3.bf16.msra.mxu1 %v2744_v21 }
0x15bd   :  { %2091 = vmatprep.subr.bf16.mxu1 %v2476_v0 }
0x15c6   :  { %v2210_v16 = vpop.eup %2209 }
0x15c7   :  { %963 = vrot.lane.b32.xlu0 %v2210_v16, %s2479_s6 }
0x15cb   :  { %724 = vrot.lane.b32.xlu0 %v2696_v26, %s2479_s6 }
0x15cf   :  { %890 = vrot.lane.b32.xlu0 %v2729_v40, %s2479_s6 }
0x1639   :  { %v964_v18 = vpop.permute.xlu0 %963 }
0x163a   :  { %v966_v2 = vmul.f32 %v964_v18, %v961_v33 }
0x163c   :  { %v968_v38 = vadd.f32 %v967_v36, %v966_v2 }
0x163d   :  { %v725_v37 = vpop.permute.xlu0 %724 }
0x163e   :  { %728 = vst.msk [vmem:[#allocation2 + $0x10] sm:$0xf] %vm395_vm3, %v725_v37  ;;  %v1899_v39 = vpack.c.bf16 %v968_v38, %v968_v38 }
0x1641   :  { %v891_v12 = vpop.permute.xlu0 %890 }
0x1642   :  { %894 = vst.msk [vmem:[#allocation2 + $0x18] sm:$0xf] %vm395_vm3, %v891_v12 }
0x1677   :  { %v1249_v20 = vpop.f32.mrf.mxu1 }
0x1678   :  { %v1262_v3 = vadd.f32 %v1249_v20, %v2766_v28  ;;  %v1255_v26 = vadd.f32 %v1249_v20, %v1207_v8 }
0x1679   :  { %v2065_v61 = vpop.f32.mrf.mxu1 }
0x167a   :  { %1264 = vrot.lane.b32.xlu1 %v1262_v3, %s2467_s22  ;;  %v1875_v24 = vmul.f32 -1.442695, %v1255_v26 }
0x167b   :  { %v1252_v22 = vpop.f32.mrf.mxu1 }
0x167c   :  { %2211 = vpow2.f32 %v1875_v24 }
0x167d   :  { %v2066_v23 = vpop.f32.mrf.mxu1 }
0x1689   :  { %v2212_v40 = vpop.eup %2211 }
0x168a   :  { %v1259_v25 = vadd.f32 1.0, %v2212_v40  ;;  %v1357_v40 = vld [vmem:[#allocation3 + $0x18] sm:$0xff] }
0x168c   :  { %2213 = vrcp.f32 %v1259_v25 }
0x1699   :  { %v2214_v27 = vpop.eup %2213 }
0x169a   :  { %v1274_v4 = vsub.f32 1.0, %v2214_v27  ;;  %v1280_v42 = vmul.f32 %v2214_v27, %v1206_v6 }
0x16ec   :  { %v1265_v29 = vpop.permute.xlu1 %1264 }
0x16ed   :  { %v1267_v30 = vmul.f32 %v2214_v27, %v1265_v29 }
0x16ef   :  { %1269 = vrot.lane.b32.xlu1 %v1267_v30, %s2467_s22 }
0x1761   :  { %v1270_v31 = vpop.permute.xlu1 %1269 }
0x1762   :  { %v1272_v32 = vadd.f32 %v1270_v31, %v1207_v8 }
0x1764   :  { %2215 = vtanh.f32 %v1272_v32 }
0x1771   :  { %v2216_v35 = vpop.eup %2215 }
0x1772   :  { %1276 = vrot.lane.b32.xlu1 %v2216_v35, %s2479_s6 }
0x1776   :  { %807 = vrot.lane.b32.xlu1 %v2711_v49, %s2479_s6 }
0x177a   :  { %973 = vrot.lane.b32.xlu1 %v1899_v39, %s2479_s6 }
0x17e4   :  { %v1277_v41 = vpop.permute.xlu1 %1276 }
0x17e5   :  { %v1279_v43 = vmul.f32 %v1277_v41, %v1274_v4 }
0x17e7   :  { %v1281_v44 = vadd.f32 %v1280_v42, %v1279_v43 }
0x17e8   :  { %v808_v45 = vpop.permute.xlu1 %807 }
0x17e9   :  { %811 = vst.msk [vmem:[#allocation2 + $0x14] sm:$0xf] %vm395_vm3, %v808_v45  ;;  %v1283_v46 = vpack.c.bf16 %v1281_v44, %v1281_v44 }
0x17eb   :  { %1285 = vrot.lane.b32.xlu0 %v1283_v46, %s2479_s6 }
0x17ec   :  { %v974_v17 = vpop.permute.xlu1 %973 }
0x17ed   :  { %977 = vst.msk [vmem:[#allocation2 + $0x1c] sm:$0xf] %vm395_vm3, %v974_v17 }
0x17f0   :  { %v2153_v47 = vld [vmem:[#allocation2 + $0x10] sm:$0xff]  }
0x17f1   :  { %2047 = vmatprep.mubr.msk.bf16.mxu0 %vm210_vm1, %v2153_v47 }
0x17f4   :  { %v2154_v49 = vld [vmem:[#allocation2 + $0x18] sm:$0xff]  }
0x17f5   :  { %2048 = vmatmul.mubr.msk.bf16.gmra.mxu0 %vm210_vm1, %v2154_v49 }
0x17f6   :  { %2071 = vmatprep.mubr.msk.bf16.mxu0 %vm2477_vm0, %v2476_v0 }
0x185d   :  { %v1286_v48 = vpop.permute.xlu0 %1285 }
0x185e   :  { %2072 = vmatmul.mubr.msk.bf16.vlgmr.msra.gmra.mxu0 %vm210_vm1, %v1286_v48 }
0x185f   :  { %2084 = vmatpush3.bf16.msra.mxu0 %v2740_v19  ;;  %2087 = vmatprep.mubr.msk.bf16.mxu0 %vm2477_vm0, %v2476_v0 }
0x1860   :  { %2085 = vmatprep.subr.bf16.mxu0 %v2476_v0 }
0x1863   :  { %2086 = vmatpush3.bf16.msra.mxu0 %v2744_v21 }
0x1864   :  { %2099 = vmatprep.subr.bf16.mxu0 %v2476_v0 }
0x18b5   :  { %v2049_v50 = vpop.f32.mrf.mxu0 }
0x18b6   :  { %v1105_v51 = vadd.f32 %v2049_v50, %v2770_v34 }
0x18b7   :  { %v1096_v52 = vpop.f32.mrf.mxu0 }
0x18b8   :  { %1117 = vst.msk [vmem:[#allocation3 + $0x30] sm:$0xff] %vm288_vm2, %v1105_v51  ;;  %v1097_v53 = vadd.f32 %v2770_v34, %v1096_v52 }
0x18b9   :  { %v2050_v54 = vpop.f32.mrf.mxu0 }
0x18ba   :  { %1115 = vst.msk [vmem:[#allocation3 + $0x20] sm:$0xff] %vm288_vm2, %v1097_v53  ;;  %v1108_v55 = vadd.f32 %v2050_v54, %v2770_v34 }
0x18bb   :  { %v1099_v56 = vpop.f32.mrf.mxu0 }
0x18bc   :  { %1118 = vst.msk [vmem:[#allocation3 + $0x38] sm:$0xff] %vm288_vm2, %v1108_v55  ;;  %v1100_v57 = vadd.f32 %v2770_v34, %v1099_v56 }
0x18be   :  { %1116 = vst.msk [vmem:[#allocation3 + $0x28] sm:$0xff] %vm288_vm2, %v1100_v57 }
0x18c1   :  { %v1432_v48 = vld [vmem:[#allocation3 + $0x20] sm:$0xff] }
0x191e   :  { %v1324_v58 = vpop.f32.mrf.mxu0 }
0x191f   :  { %v1337_v59 = vadd.f32 %v1324_v58, %v2766_v28  ;;  %v1330_v5 = vadd.f32 %v1324_v58, %v1282_v1 }
0x1920   :  { %v2073_v60 = vpop.f32.mrf.mxu0 }
0x1921   :  { %1339 = vrot.lane.b32.xlu1 %v1337_v59, %s2467_s22  ;;  %v1877_v6 = vmul.f32 -1.442695, %v1330_v5 }
0x1922   :  { %v1327_v62 = vpop.f32.mrf.mxu0 }
0x1923   :  { %2217 = vpow2.f32 %v1877_v6 }
0x1924   :  { %v2074_v63 = vpop.f32.mrf.mxu0 }
0x1930   :  { %v2218_v7 = vpop.eup %2217 }
0x1931   :  { %v1334_v10 = vadd.f32 1.0, %v2218_v7 }
0x1933   :  { %2219 = vrcp.f32 %v1334_v10 }
0x1940   :  { %v2220_v11 = vpop.eup %2219 }
0x1941   :  { %v1349_v16 = vsub.f32 1.0, %v2220_v11  ;;  %v1355_v37 = vmul.f32 %v2220_v11, %v1281_v44 }
0x1993   :  { %v1340_v13 = vpop.permute.xlu1 %1339 }
0x1994   :  { %v1342_v34 = vmul.f32 %v2220_v11, %v1340_v13 }
0x1996   :  { %1344 = vrot.lane.b32.xlu0 %v1342_v34, %s2467_s22 }
0x1a08   :  { %v1345_v9 = vpop.permute.xlu0 %1344 }
0x1a09   :  { %v1347_v14 = vadd.f32 %v1345_v9, %v1282_v1 }
0x1a0b   :  { %2221 = vtanh.f32 %v1347_v14  ;;  %v1507_v14 = vld [vmem:[#allocation3 + $0x28] sm:$0xff] }
0x1a18   :  { %v2222_v15 = vpop.eup %2221 }
0x1a19   :  { %1351 = vrot.lane.b32.xlu1 %v2222_v15, %s2479_s6 }
0x1a8b   :  { %v1352_v18 = vpop.permute.xlu1 %1351 }
0x1a8c   :  { %v1354_v12 = vmul.f32 %v1352_v18, %v1349_v16 }
0x1a8e   :  { %v1356_v20 = vadd.f32 %v1355_v37, %v1354_v12 }
0x1a90   :  { %v1358_v3 = vpack.c.bf16 %v1356_v20, %v1356_v20 }
0x1a92   :  { %1360 = vrot.lane.b32.xlu0 %v1358_v3, %s2479_s6 }
0x1b04   :  { %v1361_v61 = vpop.permute.xlu0 %1360 }
0x1b05   :  { %2080 = vmatmul.mubr.msk.bf16.vlgmr.msra.gmra.mxu1 %vm210_vm1, %v1361_v61 }
0x1b06   :  { %2092 = vmatpush3.bf16.msra.mxu1 %v2740_v19  ;;  %2095 = vmatprep.mubr.msk.bf16.mxu1 %vm2477_vm0, %v2476_v0 }
0x1b07   :  { %2093 = vmatprep.subr.bf16.mxu1 %v2476_v0 }
0x1b0a   :  { %2094 = vmatpush3.bf16.msra.mxu1 %v2744_v21 }
0x1b0b   :  { %2107 = vmatprep.subr.bf16.mxu1 %v2476_v0 }
0x1bc5   :  { %v1399_v22 = vpop.f32.mrf.mxu1 }
0x1bc6   :  { %v1412_v23 = vadd.f32 %v1399_v22, %v2766_v28  ;;  %v1405_v25 = vadd.f32 %v1399_v22, %v1357_v40 }
0x1bc7   :  { %v2081_v8 = vpop.f32.mrf.mxu1 }
0x1bc8   :  { %1414 = vrot.lane.b32.xlu1 %v1412_v23, %s2467_s22  ;;  %v1879_v27 = vmul.f32 -1.442695, %v1405_v25 }
0x1bc9   :  { %v1402_v26 = vpop.f32.mrf.mxu1 }
0x1bca   :  { %2223 = vpow2.f32 %v1879_v27 }
0x1bcb   :  { %v2082_v24 = vpop.f32.mrf.mxu1 }
0x1bd7   :  { %v2224_v29 = vpop.eup %2223 }
0x1bd8   :  { %v1409_v30 = vadd.f32 1.0, %v2224_v29 }
0x1bda   :  { %2225 = vrcp.f32 %v1409_v30 }
0x1be7   :  { %v2226_v31 = vpop.eup %2225 }
0x1be8   :  { %v1424_v38 = vsub.f32 1.0, %v2226_v31  ;;  %v1430_v4 = vmul.f32 %v2226_v31, %v1356_v20 }
0x1c3a   :  { %v1415_v32 = vpop.permute.xlu1 %1414 }
0x1c3b   :  { %v1417_v33 = vmul.f32 %v2226_v31, %v1415_v32 }
0x1c3d   :  { %1419 = vrot.lane.b32.xlu0 %v1417_v33, %s2467_s22  ;;  %v1582_v33 = vld [vmem:[#allocation3 + $0x30] sm:$0xff] }
0x1caf   :  { %v1420_v2 = vpop.permute.xlu0 %1419 }
0x1cb0   :  { %v1422_v35 = vadd.f32 %v1420_v2, %v1357_v40 }
0x1cb2   :  { %2227 = vtanh.f32 %v1422_v35 }
0x1cbf   :  { %v2228_v36 = vpop.eup %2227 }
0x1cc0   :  { %1426 = vrot.lane.b32.xlu1 %v2228_v36, %s2479_s6 }
0x1d32   :  { %v1427_v39 = vpop.permute.xlu1 %1426 }
0x1d33   :  { %v1429_v41 = vmul.f32 %v1427_v39, %v1424_v38 }
0x1d35   :  { %v1431_v42 = vadd.f32 %v1430_v4, %v1429_v41 }
0x1d37   :  { %v1433_v43 = vpack.c.bf16 %v1431_v42, %v1431_v42 }
0x1d39   :  { %1435 = vrot.lane.b32.xlu0 %v1433_v43, %s2479_s6 }
0x1dab   :  { %v1436_v44 = vpop.permute.xlu0 %1435 }
0x1dac   :  { %2088 = vmatmul.mubr.msk.bf16.vlgmr.msra.gmra.mxu0 %vm210_vm1, %v1436_v44 }
0x1dad   :  { %2100 = vmatpush3.bf16.msra.mxu0 %v2740_v19  ;;  %2103 = vmatprep.mubr.msk.bf16.mxu0 %vm2477_vm0, %v2476_v0 }
0x1dae   :  { %2101 = vmatprep.subr.bf16.mxu0 %v2476_v0 }
0x1db1   :  { %2102 = vmatpush3.bf16.msra.mxu0 %v2744_v21 }
0x1db2   :  { %2115 = vmatprep.subr.bf16.mxu0 %v2476_v0 }
0x1e6c   :  { %v1474_v45 = vpop.f32.mrf.mxu0 }
0x1e6d   :  { %v1487_v46 = vadd.f32 %v1474_v45, %v2766_v28  ;;  %v1480_v50 = vadd.f32 %v1474_v45, %v1432_v48 }
0x1e6e   :  { %v2089_v17 = vpop.f32.mrf.mxu0 }
0x1e6f   :  { %1489 = vrot.lane.b32.xlu1 %v1487_v46, %s2467_s22  ;;  %v1881_v51 = vmul.f32 -1.442695, %v1480_v50 }
0x1e70   :  { %v1477_v47 = vpop.f32.mrf.mxu0 }
0x1e71   :  { %2229 = vpow2.f32 %v1881_v51 }
0x1e72   :  { %v2090_v49 = vpop.f32.mrf.mxu0 }
0x1e7e   :  { %v2230_v52 = vpop.eup %2229 }
0x1e7f   :  { %v1484_v53 = vadd.f32 1.0, %v2230_v52 }
0x1e81   :  { %2231 = vrcp.f32 %v1484_v53 }
0x1e8e   :  { %v2232_v54 = vpop.eup %2231 }
0x1e8f   :  { %v1499_v60 = vsub.f32 1.0, %v2232_v54  ;;  %v1505_v63 = vmul.f32 %v2232_v54, %v1431_v42 }
0x1ee1   :  { %v1490_v55 = vpop.permute.xlu1 %1489 }
0x1ee2   :  { %v1492_v56 = vmul.f32 %v2232_v54, %v1490_v55 }
0x1ee4   :  { %1494 = vrot.lane.b32.xlu0 %v1492_v56, %s2467_s22  ;;  %v1657_v56 = vld [vmem:[#allocation3 + $0x38] sm:$0xff] }
0x1f56   :  { %v1495_v57 = vpop.permute.xlu0 %1494 }
0x1f57   :  { %v1497_v58 = vadd.f32 %v1495_v57, %v1432_v48 }
0x1f59   :  { %2233 = vtanh.f32 %v1497_v58 }
0x1f66   :  { %v2234_v59 = vpop.eup %2233 }
0x1f67   :  { %1501 = vrot.lane.b32.xlu1 %v2234_v59, %s2479_s6 }
0x1fd9   :  { %v1502_v62 = vpop.permute.xlu1 %1501 }
0x1fda   :  { %v1504_v1 = vmul.f32 %v1502_v62, %v1499_v60 }
0x1fdc   :  { %v1506_v5 = vadd.f32 %v1505_v63, %v1504_v1 }
0x1fde   :  { %v1508_v6 = vpack.c.bf16 %v1506_v5, %v1506_v5 }
0x1fe0   :  { %1510 = vrot.lane.b32.xlu0 %v1508_v6, %s2479_s6 }
0x2052   :  { %v1511_v7 = vpop.permute.xlu0 %1510 }
0x2053   :  { %2096 = vmatmul.mubr.msk.bf16.vlgmr.msra.gmra.mxu1 %vm210_vm1, %v1511_v7  ;;  %v2156_v7 = vld [vmem:[%s2908_s9] sm:$0xff]  }
0x2054   :  { %2108 = vmatpush3.bf16.msra.mxu1 %v2740_v19  ;;  %2111 = vmatprep.mubr.msk.bf16.mxu1 %vm2477_vm0, %v2476_v0 }
0x2055   :  { %2109 = vmatprep.subr.bf16.mxu1 %v2476_v0 }
0x2058   :  { %2110 = vmatpush3.bf16.msra.mxu1 %v2744_v21 }
0x2113   :  { %v1549_v10 = vpop.f32.mrf.mxu1 }
0x2114   :  { %v1562_v11 = vadd.f32 %v1549_v10, %v2766_v28  ;;  %v1555_v15 = vadd.f32 %v1549_v10, %v1507_v14 }
0x2115   :  { %v2097_v13 = vpop.f32.mrf.mxu1 }
0x2116   :  { %1564 = vrot.lane.b32.xlu1 %v1562_v11, %s2467_s22  ;;  %v1883_v16 = vmul.f32 -1.442695, %v1555_v15 }
0x2117   :  { %v1552_v34 = vpop.f32.mrf.mxu1 }
0x2118   :  { %2235 = vpow2.f32 %v1883_v16 }
0x2119   :  { %v2098_v9 = vpop.f32.mrf.mxu1 }
0x2125   :  { %v2236_v19 = vpop.eup %2235 }
0x2126   :  { %v1559_v18 = vadd.f32 1.0, %v2236_v19  ;;  %v1888_v19 = vld [vmem:[%s2909_s10] ss:$0 sm:$0xff] }
0x2128   :  { %2237 = vrcp.f32 %v1559_v18 }
0x2135   :  { %v2238_v37 = vpop.eup %2237 }
0x2136   :  { %v1574_v22 = vsub.f32 1.0, %v2238_v37  ;;  %v1580_v8 = vmul.f32 %v2238_v37, %v1506_v5 }
0x2188   :  { %v1565_v12 = vpop.permute.xlu1 %1564 }
0x2189   :  { %v1567_v20 = vmul.f32 %v2238_v37, %v1565_v12 }
0x218b   :  { %1569 = vrot.lane.b32.xlu0 %v1567_v20, %s2467_s22 }
0x21fd   :  { %v1570_v21 = vpop.permute.xlu0 %1569 }
0x21fe   :  { %v1572_v3 = vadd.f32 %v1570_v21, %v1507_v14 }
0x2200   :  { %2239 = vtanh.f32 %v1572_v3 }
0x220d   :  { %v2240_v61 = vpop.eup %2239 }
0x220e   :  { %1576 = vrot.lane.b32.xlu1 %v2240_v61, %s2479_s6 }
0x2280   :  { %v1577_v23 = vpop.permute.xlu1 %1576 }
0x2281   :  { %v1579_v26 = vmul.f32 %v1577_v23, %v1574_v22 }
0x2283   :  { %v1581_v24 = vadd.f32 %v1580_v8, %v1579_v26 }
0x2285   :  { %v1583_v40 = vpack.c.bf16 %v1581_v24, %v1581_v24 }
0x2287   :  { %1585 = vrot.lane.b32.xlu0 %v1583_v40, %s2479_s6 }
0x22f9   :  { %v1586_v25 = vpop.permute.xlu0 %1585 }
0x22fa   :  { %2104 = vmatmul.mubr.msk.bf16.vlgmr.msra.gmra.mxu0 %vm210_vm1, %v1586_v25 }
0x22fb   :  { %2119 = vmatprep.mubr.msk.bf16.mxu0 %vm2477_vm0, %v2476_v0 }
0x23ba   :  { %v1624_v27 = vpop.f32.mrf.mxu0 }
0x23bb   :  { %v1637_v29 = vadd.f32 %v1624_v27, %v2766_v28  ;;  %v1630_v2 = vadd.f32 %v1624_v27, %v1582_v33 }
0x23bc   :  { %v2105_v30 = vpop.f32.mrf.mxu0 }
0x23bd   :  { %1639 = vrot.lane.b32.xlu1 %v1637_v29, %s2467_s22  ;;  %v1885_v35 = vmul.f32 -1.442695, %v1630_v2 }
0x23be   :  { %v1627_v31 = vpop.f32.mrf.mxu0 }
0x23bf   :  { %2241 = vpow2.f32 %v1885_v35 }
0x23c0   :  { %v2106_v32 = vpop.f32.mrf.mxu0 }
0x23cc   :  { %v2242_v36 = vpop.eup %2241 }
0x23cd   :  { %v1634_v38 = vadd.f32 1.0, %v2242_v36 }
0x23cf   :  { %2243 = vrcp.f32 %v1634_v38 }
0x23dc   :  { %v2244_v39 = vpop.eup %2243 }
0x23dd   :  { %v1649_v45 = vsub.f32 1.0, %v2244_v39  ;;  %v1655_v17 = vmul.f32 %v2244_v39, %v1581_v24 }
0x242f   :  { %v1640_v4 = vpop.permute.xlu1 %1639 }
0x2430   :  { %v1642_v41 = vmul.f32 %v2244_v39, %v1640_v4 }
0x2432   :  { %1644 = vrot.lane.b32.xlu0 %v1642_v41, %s2467_s22 }
0x24a4   :  { %v1645_v42 = vpop.permute.xlu0 %1644 }
0x24a5   :  { %v1647_v43 = vadd.f32 %v1645_v42, %v1582_v33 }
0x24a7   :  { %2245 = vtanh.f32 %v1647_v43 }
0x24b4   :  { %v2246_v44 = vpop.eup %2245 }
0x24b5   :  { %1651 = vrot.lane.b32.xlu1 %v2246_v44, %s2479_s6 }
0x2527   :  { %v1652_v46 = vpop.permute.xlu1 %1651 }
0x2528   :  { %v1654_v47 = vmul.f32 %v1652_v46, %v1649_v45 }
0x252a   :  { %v1656_v49 = vadd.f32 %v1655_v17, %v1654_v47 }
0x252c   :  { %v1658_v48 = vpack.c.bf16 %v1656_v49, %v1656_v49 }
0x252e   :  { %1660 = vrot.lane.b32.xlu0 %v1658_v48, %s2479_s6 }
0x25a0   :  { %v1661_v50 = vpop.permute.xlu0 %1660 }
0x25a1   :  { %2112 = vmatmul.mubr.msk.bf16.vlgmr.msra.gmra.mxu1 %vm210_vm1, %v1661_v50 }
0x2661   :  { %v1699_v51 = vpop.f32.mrf.mxu1 }
0x2662   :  { %v1712_v52 = vadd.f32 %v1699_v51, %v2766_v28  ;;  %v1705_v57 = vadd.f32 %v1699_v51, %v1657_v56  ;;  %v2155_v28 = vld [vmem:[%s2908_s9 + $0x8] sm:$0xff]   ;;  %s2480_s9 = smov [#allocation19]  }
0x2663   :  { %v2113_v53 = vpop.f32.mrf.mxu1  ;;  %2116 = vmatpush3.bf16.msra.mxu0 %v2155_v28  ;;  %s1809_s27 = sshll.u32 %s2480_s9, 4  ;;  %s1810_s27 = int_to_ptr.vmem [resolvable:$true] %s1809_s27 }
0x2664   :  { %1714 = vrot.lane.b32.xlu1 %v1712_v52, %s2467_s22  ;;  %v1887_v58 = vmul.f32 -1.442695, %v1705_v57  ;;  %2117 = vmatprep.subr.bf16.mxu0 %v2476_v0  ;;  %s2433_s7 = scalar_lea.vmem %s1810_s27, 128  ;;  %p2438_p4 = scmp.lt.s32.totalorder %s1810_s27, %s1810_s27 }
0x2665   :  { %v1702_v54 = vpop.f32.mrf.mxu1  ;;  %p2434_p3 = scmp.ne.s32.totalorder %s1810_s27, %s2433_s7  ;;  %p2439_p5 = scmp.lt.s32.totalorder %s2433_s7, %s2433_s7 }
0x2666   :  { %2247 = vpow2.f32 %v1887_v58 }
0x2667   :  { %v2114_v55 = vpop.f32.mrf.mxu1  ;;  %2118 = vmatpush3.bf16.msra.mxu0 %v2156_v7  ;;  %p2440_p6 = por %p2439_p5, %p2438_p4 }
0x2669   :  { %p2441_p7 = pnand %p2440_p6, %p2434_p3 }
0x2673   :  { %v2248_v59 = vpop.eup %2247 }
0x2674   :  { %v1709_v60 = vadd.f32 1.0, %v2248_v59 }
0x2676   :  { %2249 = vrcp.f32 %v1709_v60 }
0x2683   :  { %v2250_v62 = vpop.eup %2249 }
0x2684   :  { %v1724_v11 = vsub.f32 1.0, %v2250_v62  ;;  %v1730_v34 = vmul.f32 %v2250_v62, %v1656_v49 }
0x26d6   :  { %v1715_v63 = vpop.permute.xlu1 %1714 }
0x26d7   :  { %v1717_v1 = vmul.f32 %v2250_v62, %v1715_v63 }
0x26d9   :  { %1719 = vrot.lane.b32.xlu0 %v1717_v1, %s2467_s22 }
0x274b   :  { %v1720_v5 = vpop.permute.xlu0 %1719 }
0x274c   :  { %v1722_v6 = vadd.f32 %v1720_v5, %v1657_v56 }
0x274e   :  { %2251 = vtanh.f32 %v1722_v6 }
0x275b   :  { %v2252_v10 = vpop.eup %2251 }
0x275c   :  { %1726 = vrot.lane.b32.xlu1 %v2252_v10, %s2479_s6 }
0x27ce   :  { %v1727_v13 = vpop.permute.xlu1 %1726 }
0x27cf   :  { %v1729_v9 = vmul.f32 %v1727_v13, %v1724_v11 }
0x27d1   :  { %v1731_v14 = vadd.f32 %v1730_v34, %v1729_v9 }
0x27d3   :  { %v1736_v15 = vpack.c.bf16 %v1731_v14, %v1731_v14 }
0x27d5   :  { %1745 = vrot.lane.b32.xlu0 %v1736_v15, %s2479_s6 }
0x2847   :  { %v1746_v16 = vpop.permute.xlu0 %1745 }
0x2848   :  { %2120 = vmatmul.mubr.msk.bf16.vlgmr.msra.gmra.mxu0 %vm210_vm1, %v1746_v16 }
0x2908   :  { %v1796_v0 = vpop.f32.mrf.mxu0 }
0x2909   :  { %v1797_v18 = vadd.f32 %v1888_v19, %v1796_v0 }
0x290a   :  { %v2121_v37 = vpop.f32.mrf.mxu0 }
0x290b   :  { %1802 = vst.msk [vmem:[#allocation19] sm:$0xff] %vm210_vm1, %v1797_v18 }
0x290c   :  { %v1799_v12 = vpop.f32.mrf.mxu0 }
0x290d   :  { %2444 = shalt.err (!%p2441_p7)
}
0x290e   :  { %1812 = dma.vmem_to_hbm [thread:$0]  %s1810_s27, 128, %s2910_s11, [#allocation6]   ;;  %v2122_v20 = vpop.f32.mrf.mxu0 }
0x290f   :  { %2463 = dma.done.wait [#allocation6], 128  }
0x2910   :  { %2464 = vsyncadd [#allocation6], 4294967168 }
0x2911   :  { %1816 = vsyncpa [#allocation5], 1 }
0x2912   :  { %1817 = vsyncpa [#allocation8], 1 }
0x2913   :  { %1818 = vsyncpa [#allocation11], 1 }
0x2914   :  { %1819 = vsyncpa [#allocation14], 1 }
0x2915   :  { %1820 = vsyncpa [#allocation17], 1 }
0x2916   :  { %1821 = vsyncpa [#allocation6], 1 }

</bundles_post_ra>
